<compile_context>
chip_gen: v5e
topology: v5e:2x2
jax: 0.10.0
libtpu: 0.0.40
codegen_flags: <defaults>
</compile_context>

<pallas_src>
import functools
import math

import jax
import jax.numpy as jnp
from jax.experimental import pallas as pl
from jax.experimental.pallas import tpu as pltpu


ACT_DTYPE = jnp.bfloat16          # activations + matmul weights (f32 accumulation)
EPS_LN = 1e-5
EPS_BN = 1e-5
# Explicit scoped-VMEM budget (safe on v5e/v6e/v7x); re-derive tiles for v7x's 64 MiB.
VMEM_LIMIT_BYTES = 32 * 1024 * 1024


# ----------------------------------------------------------------------------
# tiling helpers
# ----------------------------------------------------------------------------
def _row_tile(m, target=256):
    """Largest divisor of m that is <= target and a multiple of 8 (else m)."""
    if m <= target:
        return m
    t = target - (target % 8)
    while t >= 8:
        if m % t == 0:
            return t
        t -= 8
    return m


def _k_tile(k, target=1024):
    """Largest divisor of k that is <= target and a multiple of 128 (else k)."""
    if k <= target:
        return k
    t = target - (target % 128)
    while t >= 128:
        if k % t == 0:
            return t
        t -= 128
    return k


# ----------------------------------------------------------------------------
# Pallas kernels
# ----------------------------------------------------------------------------
def conv_bn_relu_pe_kernel(x_ref, w_ref, shift_ref, pe_ref, o_ref, acc_ref):
    """(1x2 conv as K-tiled matmul) + folded BN shift + ReLU + positional encoding.

    Grid = (B, K/tk).  BN scale is pre-folded into w; shift carries conv bias + BN.
    PE is passed as [T, E] (not materialized per batch) and broadcast over B here.
    """
    @pl.when(pl.program_id(1) == 0)
    def _():
        acc_ref[...] = jnp.zeros_like(acc_ref)

    acc_ref[...] += jnp.dot(x_ref[0], w_ref[...], preferred_element_type=jnp.float32)

    @pl.when(pl.program_id(1) == pl.num_programs(1) - 1)
    def _():
        y = acc_ref[...] + shift_ref[...]
        y = jnp.maximum(y, 0.0)
        o_ref[0] = (y + pe_ref[...]).astype(o_ref.dtype)


def ln_qkv_kernel(x_ref, g_ref, b_ref, w_ref, bias_ref, o_ref):
    """Fused LayerNorm + single [E, 3E] QKV projection (lane-dense 3E output)."""
    x = x_ref[...].astype(jnp.float32)
    mean = jnp.mean(x, axis=-1, keepdims=True)
    var = jnp.mean(jnp.square(x - mean), axis=-1, keepdims=True)
    h = (x - mean) * jax.lax.rsqrt(var + EPS_LN)
    h = h * g_ref[...] + b_ref[...]
    y = jnp.dot(h.astype(w_ref.dtype), w_ref[...],
                preferred_element_type=jnp.float32) + bias_ref[...]
    o_ref[...] = y.astype(o_ref.dtype)


def attn_proj_res_kernel(qkv_ref, x_ref, wo_ref, bo_ref, o_ref, *, num_head, scale):
    """Per-batch-element multi-head attention + output projection + residual.

    All heads of one batch element are processed in a single grid step (amortizes
    the per-step overhead num_head-fold and avoids XLA-level split/merge transposes).
    """
    E = x_ref.shape[2]
    Dh = E // num_head
    qkv = qkv_ref[0].astype(jnp.float32)               # [S, 3E]

    ctx_heads = []
    for h in range(num_head):                          # static unroll (num_head small)
        q = qkv[:, h * Dh:(h + 1) * Dh]                # [S, Dh]
        k = qkv[:, E + h * Dh:E + (h + 1) * Dh]
        v = qkv[:, 2 * E + h * Dh:2 * E + (h + 1) * Dh]
        # q @ k^T without materializing a transpose
        s = jax.lax.dot_general(q, k, (((1,), (1,)), ((), ())),
                                preferred_element_type=jnp.float32) * scale
        m = jnp.max(s, axis=-1, keepdims=True)
        p = jnp.exp(s - m)
        p = p * pl.reciprocal(jnp.sum(p, axis=-1, keepdims=True), approx=True)
        ctx_heads.append(jnp.dot(p, v, preferred_element_type=jnp.float32))
    ctx = jnp.concatenate(ctx_heads, axis=-1)          # [S, E]

    y = jnp.dot(ctx.astype(wo_ref.dtype), wo_ref[...],
                preferred_element_type=jnp.float32) + bo_ref[...]
    o_ref[0] = (x_ref[0].astype(jnp.float32) + y).astype(o_ref.dtype)


def mlp_block_kernel(x_ref, g_ref, b_ref, w1_ref, b1_ref, w2_ref, b2_ref, o_ref):
    """Fused LayerNorm + (w1 + ReLU + w2) MLP + residual add."""
    x = x_ref[...].astype(jnp.float32)
    mean = jnp.mean(x, axis=-1, keepdims=True)
    var = jnp.mean(jnp.square(x - mean), axis=-1, keepdims=True)
    h = (x - mean) * jax.lax.rsqrt(var + EPS_LN)
    h = h * g_ref[...] + b_ref[...]
    h1 = jnp.dot(h.astype(w1_ref.dtype), w1_ref[...],
                 preferred_element_type=jnp.float32) + b1_ref[...]
    h1 = jnp.maximum(h1, 0.0)
    y = jnp.dot(h1.astype(w2_ref.dtype), w2_ref[...],
                preferred_element_type=jnp.float32) + b2_ref[...]
    o_ref[...] = (x + y).astype(o_ref.dtype)


# ----------------------------------------------------------------------------
# Pallas wrappers
# ----------------------------------------------------------------------------
def conv_bn_relu_pe(x_btk, w_kE, shift_1E, pe_TE):
    B, T, K = x_btk.shape
    E = w_kE.shape[1]
    tk = _k_tile(K)
    return pl.pallas_call(
        conv_bn_relu_pe_kernel,
        out_shape=jax.ShapeDtypeStruct((B, T, E), ACT_DTYPE),
        grid=(B, K // tk),
        in_specs=[
            pl.BlockSpec((1, T, tk), lambda b, k: (b, 0, k)),
            pl.BlockSpec((tk, E), lambda b, k: (k, 0)),
            pl.BlockSpec((1, E), lambda b, k: (0, 0)),
            pl.BlockSpec((T, E), lambda b, k: (0, 0)),
        ],
        out_specs=pl.BlockSpec((1, T, E), lambda b, k: (b, 0, 0)),
        scratch_shapes=[pltpu.VMEM((T, E), jnp.float32)],
        compiler_params=pltpu.CompilerParams(
            dimension_semantics=("parallel", "arbitrary"),
            vmem_limit_bytes=VMEM_LIMIT_BYTES),
    )(x_btk, w_kE, shift_1E, pe_TE)


def ln_qkv(x, gamma, beta, wqkv, bqkv):
    M, E = x.shape
    N = wqkv.shape[1]
    tm = _row_tile(M)
    return pl.pallas_call(
        ln_qkv_kernel,
        out_shape=jax.ShapeDtypeStruct((M, N), ACT_DTYPE),
        grid=(M // tm,),
        in_specs=[
            pl.BlockSpec((tm, E), lambda i: (i, 0)),
            pl.BlockSpec((1, E), lambda i: (0, 0)),
            pl.BlockSpec((1, E), lambda i: (0, 0)),
            pl.BlockSpec((E, N), lambda i: (0, 0)),
            pl.BlockSpec((1, N), lambda i: (0, 0)),
        ],
        out_specs=pl.BlockSpec((tm, N), lambda i: (i, 0)),
        compiler_params=pltpu.CompilerParams(
            dimension_semantics=("parallel",),
            vmem_limit_bytes=VMEM_LIMIT_BYTES),
    )(x, gamma, beta, wqkv, bqkv)


def attn_proj_residual(qkv, x, wo, bo, num_head):
    B, S, E = x.shape
    kern = functools.partial(attn_proj_res_kernel, num_head=num_head,
                             scale=(E // num_head) ** -0.5)
    return pl.pallas_call(
        kern,
        out_shape=jax.ShapeDtypeStruct((B, S, E), ACT_DTYPE),
        grid=(B,),
        in_specs=[
            pl.BlockSpec((1, S, 3 * E), lambda b: (b, 0, 0)),
            pl.BlockSpec((1, S, E), lambda b: (b, 0, 0)),
            pl.BlockSpec((E, E), lambda b: (0, 0)),
            pl.BlockSpec((1, E), lambda b: (0, 0)),
        ],
        out_specs=pl.BlockSpec((1, S, E), lambda b: (b, 0, 0)),
        compiler_params=pltpu.CompilerParams(
            dimension_semantics=("parallel",),
            vmem_limit_bytes=VMEM_LIMIT_BYTES),
    )(qkv, x, wo, bo)


def mlp_block(x, gamma, beta, w1, b1, w2, b2):
    M, E = x.shape
    H = w1.shape[1]
    tm = _row_tile(M)
    return pl.pallas_call(
        mlp_block_kernel,
        out_shape=jax.ShapeDtypeStruct((M, E), ACT_DTYPE),
        grid=(M // tm,),
        in_specs=[
            pl.BlockSpec((tm, E), lambda i: (i, 0)),
            pl.BlockSpec((1, E), lambda i: (0, 0)),
            pl.BlockSpec((1, E), lambda i: (0, 0)),
            pl.BlockSpec((E, H), lambda i: (0, 0)),
            pl.BlockSpec((1, H), lambda i: (0, 0)),
            pl.BlockSpec((H, E), lambda i: (0, 0)),
            pl.BlockSpec((1, E), lambda i: (0, 0)),
        ],
        out_specs=pl.BlockSpec((tm, E), lambda i: (i, 0)),
        compiler_params=pltpu.CompilerParams(
            dimension_semantics=("parallel",),
            vmem_limit_bytes=VMEM_LIMIT_BYTES),
    )(x, gamma, beta, w1, b1, w2, b2)


# ----------------------------------------------------------------------------
# Parameters (deterministic, in-script); BN folded into conv weights here once.
# ----------------------------------------------------------------------------
def _uniform(key, shape, bound):
    return jax.random.uniform(key, shape, jnp.float32, -bound, bound)


def positional_encoding(seq_len, d_model):
    position = jnp.arange(seq_len, dtype=jnp.float32)[:, None]
    div_term = jnp.exp(jnp.arange(0, d_model, 2, dtype=jnp.float32)
                       * (-math.log(10000.0) / d_model))
    pe = jnp.zeros((seq_len, d_model), jnp.float32)
    pe = pe.at[:, 0::2].set(jnp.sin(position * div_term))
    pe = pe.at[:, 1::2].set(jnp.cos(position * div_term))
    return pe


def init_params(key, c_in, dim_embedding, prefix_length, num_layers, num_head):
    E = dim_embedding
    keys = jax.random.split(key, 8 + num_layers)
    fan_in_conv = c_in * 2

    conv_w = _uniform(keys[0], (c_in * 2, E), math.sqrt(6.0 / fan_in_conv))
    conv_b = _uniform(keys[1], (E,), 1.0 / math.sqrt(fan_in_conv))
    bn_gamma = 1.0 + 0.1 * jax.random.normal(keys[2], (E,), jnp.float32)
    bn_beta = 0.1 * jax.random.normal(keys[3], (E,), jnp.float32)
    bn_mean = jnp.zeros((E,), jnp.float32)
    bn_var = jnp.ones((E,), jnp.float32)

    # Fold eval-mode BatchNorm + conv bias into a single weight / shift (done once,
    # outside the hot path).
    scale = bn_gamma / jnp.sqrt(bn_var + EPS_BN)
    conv_w_folded = (conv_w * scale[None, :]).astype(ACT_DTYPE)
    conv_shift = ((conv_b - bn_mean) * scale + bn_beta).reshape(1, E)

    params = {
        "conv_w": conv_w_folded,                       # [C_in*2, E] bf16, BN-scaled
        "conv_shift": conv_shift,                      # [1, E] f32
        "prefix_const": _uniform(keys[4], (prefix_length, E),
                                 math.sqrt(6.0 / E)).astype(ACT_DTYPE),
    }

    layers = []
    for l in range(num_layers):
        lk = jax.random.split(keys[8 + l], 12)
        bw = 1.0 / math.sqrt(E)
        bh = 1.0 / math.sqrt(2 * E)
        wq = _uniform(lk[0], (E, E), bw)
        wk = _uniform(lk[2], (E, E), bw)
        wv = _uniform(lk[4], (E, E), bw)
        bq = _uniform(lk[1], (E,), bw)
        bk = _uniform(lk[3], (E,), bw)
        bv = _uniform(lk[5], (E,), bw)
        layers.append({
            "ln1_g": jnp.ones((1, E), jnp.float32), "ln1_b": jnp.zeros((1, E), jnp.float32),
            "wqkv": jnp.concatenate([wq, wk, wv], axis=1).astype(ACT_DTYPE),   # [E, 3E]
            "bqkv": jnp.concatenate([bq, bk, bv]).reshape(1, 3 * E),
            "wo": _uniform(lk[6], (E, E), bw).astype(ACT_DTYPE),
            "bo": _uniform(lk[7], (E,), bw).reshape(1, E),
            "ln2_g": jnp.ones((1, E), jnp.float32), "ln2_b": jnp.zeros((1, E), jnp.float32),
            "w1": _uniform(lk[8], (E, 2 * E), bw).astype(ACT_DTYPE),
            "b1": _uniform(lk[9], (2 * E,), bw).reshape(1, 2 * E),
            "w2": _uniform(lk[10], (2 * E, E), bh).astype(ACT_DTYPE),
            "b2": _uniform(lk[11], (E,), bh).reshape(1, E),
        })
    params["layers"] = layers
    return params


# ----------------------------------------------------------------------------
# Forward pass
# ----------------------------------------------------------------------------
def transformer_layer(x, lp, num_head):
    """Pre-norm encoder layer in 3 fused pallas_calls."""
    B, S, E = x.shape
    xf = x.reshape(B * S, E)

    qkv = ln_qkv(xf, lp["ln1_g"], lp["ln1_b"], lp["wqkv"], lp["bqkv"])   # [B*S, 3E]
    x = attn_proj_residual(qkv.reshape(B, S, 3 * E), x, lp["wo"], lp["bo"], num_head)

    xf = x.reshape(B * S, E)
    xf = mlp_block(xf, lp["ln2_g"], lp["ln2_b"],
                   lp["w1"], lp["b1"], lp["w2"], lp["b2"])
    return xf.reshape(B, S, E)


def mapping_network_forward(params, x_nchw, prefix_length, num_head):
    """x_nchw: [B, C_in, T, 2] (same NCHW layout the PyTorch module expects)."""
    B, C, T, W = x_nchw.shape
    assert W == 2, "Conv kernel (1,2) with no padding squeezes the width-2 axis."
    E = params["conv_w"].shape[1]

    # 1x2 conv -> matmul over K = C*2; keep [B, T, K] so PE can be batch-broadcast.
    x_btk = x_nchw.transpose(0, 2, 1, 3).reshape(B, T, C * W).astype(ACT_DTYPE)

    pe = positional_encoding(T, E)                                    # [T, E] f32
    x_seq = conv_bn_relu_pe(x_btk, params["conv_w"], params["conv_shift"], pe)

    prefix = jnp.broadcast_to(params["prefix_const"][None], (B, prefix_length, E))
    h = jnp.concatenate([x_seq, prefix], axis=1)                      # [B, T+P, E]

    for lp in params["layers"]:
        h = transformer_layer(h, lp, num_head)

    return h[:, -prefix_length:]                                      # [B, P, E]


# ----------------------------------------------------------------------------
if __name__ == "__main__":
    # Small, module-consistent shapes (original module uses C_in=2048, num_layers=8)
    B, C_IN, T = 2, 64, 8
    DIM_EMBEDDING = 32          # must be divisible by num_head=8
    PREFIX_LENGTH = 4
    NUM_LAYERS = 2
    NUM_HEAD = 8

    key = jax.random.PRNGKey(0)
    k_params, k_input = jax.random.split(key)
    params = init_params(k_params, C_IN, DIM_EMBEDDING, PREFIX_LENGTH,
                         NUM_LAYERS, NUM_HEAD)
    x = jax.random.normal(k_input, (B, C_IN, T, 2), jnp.float32)      # NCHW input

    fwd = jax.jit(functools.partial(mapping_network_forward,
                                    prefix_length=PREFIX_LENGTH,
                                    num_head=NUM_HEAD))
    out = fwd(params, x)
    out = jax.block_until_ready(out)

    assert out.shape == (B, PREFIX_LENGTH, DIM_EMBEDDING)
    assert bool(jnp.all(jnp.isfinite(out.astype(jnp.float32))))
    print("KERNEL_OK")
</pallas_src>

<mosaic_0001>
module attributes {stable_mosaic.version = 11 : i64} {
  func.func @conv_bn_relu_pe_kernel(%arg0: i32, %arg1: i32, %arg2: memref<1x8x128xbf16, #tpu.memory_space<vmem>>, %arg3: memref<128x32xbf16, #tpu.memory_space<vmem>>, %arg4: memref<1x32xf32, #tpu.memory_space<vmem>>, %arg5: memref<8x32xf32, #tpu.memory_space<vmem>>, %arg6: memref<1x8x32xbf16, #tpu.memory_space<vmem>>, %arg7: memref<8x32xf32, #tpu.memory_space<vmem>>) attributes {dimension_semantics = [#tpu.dimension_semantics<parallel>, #tpu.dimension_semantics<arbitrary>], iteration_bounds = array<i64: 2, 1>, scalar_prefetch = 0 : i64, scratch_operands = 1 : i64, tpu.core_type = #tpu.core_type<tc>, window_params = [{transform_indices = @transform_0, window_bounds = array<i64: 1, 8, 128>}, {transform_indices = @transform_1, window_bounds = array<i64: 128, 32>}, {pipeline_mode = #tpu.pipeline_mode<synchronous>, transform_indices = @transform_2, window_bounds = array<i64: 1, 32>}, {pipeline_mode = #tpu.pipeline_mode<synchronous>, transform_indices = @transform_3, window_bounds = array<i64: 8, 32>}, {transform_indices = @transform_4, window_bounds = array<i64: 1, 8, 32>}]} {
    %c0_i32 = arith.constant 0 : i32
    %0 = arith.cmpi eq, %arg1, %c0_i32 : i32
    %1 = arith.extui %0 : i1 to i32
    %c0_i32_0 = arith.constant 0 : i32
    %2 = arith.cmpi ne, %1, %c0_i32_0 : i32
    scf.if %2 {
      %cst_11 = arith.constant 0.000000e+00 : f32
      %13 = vector.broadcast %cst_11 : f32 to vector<8x32xf32>
      %c0_12 = arith.constant 0 : index
      %c0_13 = arith.constant 0 : index
      %14 = vector.load %arg7[%c0_12, %c0_13] : memref<8x32xf32, #tpu.memory_space<vmem>>, vector<8x32xf32>
      tpu.vector_store %arg7[%c0_12, %c0_13], %13 {strides = array<i32>} : memref<8x32xf32, #tpu.memory_space<vmem>>, vector<8x32xf32>,
    } else {
    }
    %c0 = arith.constant 0 : index
    %c0_1 = arith.constant 0 : index
    %3 = vector.load %arg7[%c0, %c0_1] : memref<8x32xf32, #tpu.memory_space<vmem>>, vector<8x32xf32>
    %c0_2 = arith.constant 0 : index
    %c0_3 = arith.constant 0 : index
    %c0_4 = arith.constant 0 : index
    %4 = vector.load %arg2[%c0_2, %c0_3, %c0_4] : memref<1x8x128xbf16, #tpu.memory_space<vmem>>, vector<1x8x128xbf16>
    %5 = vector.shape_cast %4 : vector<1x8x128xbf16> to vector<8x128xbf16>
    %c0_5 = arith.constant 0 : index
    %c0_6 = arith.constant 0 : index
    %6 = vector.load %arg3[%c0_5, %c0_6] : memref<128x32xbf16, #tpu.memory_space<vmem>>, vector<128x32xbf16>
    %cst = arith.constant dense<0.000000e+00> : vector<8x32xf32>
    %7 = tpu.matmul %5, %6, %cst {dimension_numbers = #tpu.dot_dimension_numbers<[1], [0], [0], [1], [0, 0, 1, 1], [], []>} : vector<8x128xbf16>, vector<128x32xbf16>, vector<8x32xf32> -> vector<8x32xf32>
    %8 = arith.addf %3, %7 : vector<8x32xf32>
    %c0_7 = arith.constant 0 : index
    %c0_8 = arith.constant 0 : index
    %9 = vector.load %arg7[%c0_7, %c0_8] : memref<8x32xf32, #tpu.memory_space<vmem>>, vector<8x32xf32>
    tpu.vector_store %arg7[%c0_7, %c0_8], %8 {strides = array<i32>} : memref<8x32xf32, #tpu.memory_space<vmem>>, vector<8x32xf32>,
    %c0_i32_9 = arith.constant 0 : i32
    %10 = arith.cmpi eq, %arg1, %c0_i32_9 : i32
    %11 = arith.extui %10 : i1 to i32
    %c0_i32_10 = arith.constant 0 : i32
    %12 = arith.cmpi ne, %11, %c0_i32_10 : i32
    scf.if %12 {
      %c0_11 = arith.constant 0 : index
      %c0_12 = arith.constant 0 : index
      %13 = vector.load %arg7[%c0_11, %c0_12] : memref<8x32xf32, #tpu.memory_space<vmem>>, vector<8x32xf32>
      %c0_13 = arith.constant 0 : index
      %c0_14 = arith.constant 0 : index
      %14 = vector.load %arg4[%c0_13, %c0_14] : memref<1x32xf32, #tpu.memory_space<vmem>>, vector<1x32xf32>
      %15 = vector.broadcast %14 : vector<1x32xf32> to vector<8x32xf32>
      %16 = arith.addf %13, %15 : vector<8x32xf32>
      %cst_15 = arith.constant 0.000000e+00 : f32
      %17 = vector.broadcast %cst_15 : f32 to vector<8x32xf32>
      %18 = arith.maximumf %16, %17 : vector<8x32xf32>
      %c0_16 = arith.constant 0 : index
      %c0_17 = arith.constant 0 : index
      %19 = vector.load %arg5[%c0_16, %c0_17] : memref<8x32xf32, #tpu.memory_space<vmem>>, vector<8x32xf32>
      %20 = arith.addf %18, %19 : vector<8x32xf32>
      %21 = arith.truncf %20 : vector<8x32xf32> to vector<8x32xbf16>
      %c0_18 = arith.constant 0 : index
      %c0_19 = arith.constant 0 : index
      %c0_20 = arith.constant 0 : index
      %22 = vector.load %arg6[%c0_18, %c0_19, %c0_20] : memref<1x8x32xbf16, #tpu.memory_space<vmem>>, vector<1x8x32xbf16>
      %23 = vector.shape_cast %22 : vector<1x8x32xbf16> to vector<8x32xbf16>
      %24 = vector.shape_cast %21 : vector<8x32xbf16> to vector<1x8x32xbf16>
      tpu.vector_store %arg6[%c0_18, %c0_19, %c0_20], %24 {strides = array<i32>} : memref<1x8x32xbf16, #tpu.memory_space<vmem>>, vector<1x8x32xbf16>,
    } else {
    }
    return
  }
  func.func @transform_0(%arg0: i32, %arg1: i32) -> (i32, i32, i32) {
    %c0_i32 = arith.constant 0 : i32
    %c0_i32_0 = arith.constant 0 : i32
    return %arg0, %c0_i32, %arg1 : i32, i32, i32
  }
  func.func @transform_1(%arg0: i32, %arg1: i32) -> (i32, i32) {
    %c0_i32 = arith.constant 0 : i32
    %c0_i32_0 = arith.constant 0 : i32
    return %arg1, %c0_i32 : i32, i32
  }
  func.func @transform_2(%arg0: i32, %arg1: i32) -> (i32, i32) {
    %c0_i32 = arith.constant 0 : i32
    %c0_i32_0 = arith.constant 0 : i32
    %c0_i32_1 = arith.constant 0 : i32
    return %c0_i32, %c0_i32_0 : i32, i32
  }
  func.func @transform_3(%arg0: i32, %arg1: i32) -> (i32, i32) {
    %c0_i32 = arith.constant 0 : i32
    %c0_i32_0 = arith.constant 0 : i32
    %c0_i32_1 = arith.constant 0 : i32
    return %c0_i32, %c0_i32_0 : i32, i32
  }
  func.func @transform_4(%arg0: i32, %arg1: i32) -> (i32, i32, i32) {
    %c0_i32 = arith.constant 0 : i32
    %c0_i32_0 = arith.constant 0 : i32
    %c0_i32_1 = arith.constant 0 : i32
    return %arg0, %c0_i32, %c0_i32_0 : i32, i32, i32
  }
}

module attributes {stable_mosaic.version = 11 : i64} {
  func.func @ln_qkv_kernel(%arg0: i32, %arg1: memref<24x32xbf16, #tpu.memory_space<vmem>>, %arg2: memref<1x32xf32, #tpu.memory_space<vmem>>, %arg3: memref<1x32xf32, #tpu.memory_space<vmem>>, %arg4: memref<32x96xbf16, #tpu.memory_space<vmem>>, %arg5: memref<1x96xf32, #tpu.memory_space<vmem>>, %arg6: memref<24x96xbf16, #tpu.memory_space<vmem>>) attributes {dimension_semantics = [#tpu.dimension_semantics<parallel>], iteration_bounds = array<i64: 1>, scalar_prefetch = 0 : i64, scratch_operands = 0 : i64, tpu.core_type = #tpu.core_type<tc>, window_params = [{transform_indices = @transform_0, window_bounds = array<i64: 24, 32>}, {pipeline_mode = #tpu.pipeline_mode<synchronous>, transform_indices = @transform_1, window_bounds = array<i64: 1, 32>}, {pipeline_mode = #tpu.pipeline_mode<synchronous>, transform_indices = @transform_2, window_bounds = array<i64: 1, 32>}, {pipeline_mode = #tpu.pipeline_mode<synchronous>, transform_indices = @transform_3, window_bounds = array<i64: 32, 96>}, {pipeline_mode = #tpu.pipeline_mode<synchronous>, transform_indices = @transform_4, window_bounds = array<i64: 1, 96>}, {transform_indices = @transform_5, window_bounds = array<i64: 24, 96>}]} {
    %c0 = arith.constant 0 : index
    %c0_0 = arith.constant 0 : index
    %0 = vector.load %arg1[%c0, %c0_0] : memref<24x32xbf16, #tpu.memory_space<vmem>>, vector<24x32xbf16>
    %1 = arith.extf %0 : vector<24x32xbf16> to vector<24x32xf32>
    %cst = arith.constant dense<0.000000e+00> : vector<24xf32>
    %2 = vector.multi_reduction <add>, %1, %cst [1] : vector<24x32xf32> to vector<24xf32>
    %3 = vector.shape_cast %2 : vector<24xf32> to vector<24x1xf32>
    %cst_1 = arith.constant 3.200000e+01 : f32
    %4 = vector.broadcast %cst_1 : f32 to vector<24x1xf32>
    %5 = arith.divf %3, %4 : vector<24x1xf32>
    %6 = vector.broadcast %5 : vector<24x1xf32> to vector<24x32xf32>
    %7 = arith.subf %1, %6 : vector<24x32xf32>
    %8 = arith.mulf %7, %7 : vector<24x32xf32>
    %cst_2 = arith.constant dense<0.000000e+00> : vector<24xf32>
    %9 = vector.multi_reduction <add>, %8, %cst_2 [1] : vector<24x32xf32> to vector<24xf32>
    %10 = vector.shape_cast %9 : vector<24xf32> to vector<24x1xf32>
    %cst_3 = arith.constant 3.200000e+01 : f32
    %11 = vector.broadcast %cst_3 : f32 to vector<24x1xf32>
    %12 = arith.divf %10, %11 : vector<24x1xf32>
    %13 = vector.broadcast %5 : vector<24x1xf32> to vector<24x32xf32>
    %14 = arith.subf %1, %13 : vector<24x32xf32>
    %cst_4 = arith.constant 9.99999974E-6 : f32
    %15 = vector.broadcast %cst_4 : f32 to vector<24x1xf32>
    %16 = arith.addf %12, %15 : vector<24x1xf32>
    %17 = math.rsqrt %16 : vector<24x1xf32>
    %18 = vector.broadcast %17 : vector<24x1xf32> to vector<24x32xf32>
    %19 = arith.mulf %14, %18 : vector<24x32xf32>
    %c0_5 = arith.constant 0 : index
    %c0_6 = arith.constant 0 : index
    %20 = vector.load %arg2[%c0_5, %c0_6] : memref<1x32xf32, #tpu.memory_space<vmem>>, vector<1x32xf32>
    %21 = vector.broadcast %20 : vector<1x32xf32> to vector<24x32xf32>
    %22 = arith.mulf %19, %21 : vector<24x32xf32>
    %c0_7 = arith.constant 0 : index
    %c0_8 = arith.constant 0 : index
    %23 = vector.load %arg3[%c0_7, %c0_8] : memref<1x32xf32, #tpu.memory_space<vmem>>, vector<1x32xf32>
    %24 = vector.broadcast %23 : vector<1x32xf32> to vector<24x32xf32>
    %25 = arith.addf %22, %24 : vector<24x32xf32>
    %26 = arith.truncf %25 : vector<24x32xf32> to vector<24x32xbf16>
    %c0_9 = arith.constant 0 : index
    %c0_10 = arith.constant 0 : index
    %27 = vector.load %arg4[%c0_9, %c0_10] : memref<32x96xbf16, #tpu.memory_space<vmem>>, vector<32x96xbf16>
    %cst_11 = arith.constant dense<0.000000e+00> : vector<24x96xf32>
    %28 = tpu.matmul %26, %27, %cst_11 {dimension_numbers = #tpu.dot_dimension_numbers<[1], [0], [0], [1], [0, 0, 1, 1], [], []>} : vector<24x32xbf16>, vector<32x96xbf16>, vector<24x96xf32> -> vector<24x96xf32>
    %c0_12 = arith.constant 0 : index
    %c0_13 = arith.constant 0 : index
    %29 = vector.load %arg5[%c0_12, %c0_13] : memref<1x96xf32, #tpu.memory_space<vmem>>, vector<1x96xf32>
    %30 = vector.broadcast %29 : vector<1x96xf32> to vector<24x96xf32>
    %31 = arith.addf %28, %30 : vector<24x96xf32>
    %32 = arith.truncf %31 : vector<24x96xf32> to vector<24x96xbf16>
    %c0_14 = arith.constant 0 : index
    %c0_15 = arith.constant 0 : index
    %33 = vector.load %arg6[%c0_14, %c0_15] : memref<24x96xbf16, #tpu.memory_space<vmem>>, vector<24x96xbf16>
    tpu.vector_store %arg6[%c0_14, %c0_15], %32 {strides = array<i32>} : memref<24x96xbf16, #tpu.memory_space<vmem>>, vector<24x96xbf16>,
    return
  }
  func.func @transform_0(%arg0: i32) -> (i32, i32) {
    %c0_i32 = arith.constant 0 : i32
    %c0_i32_0 = arith.constant 0 : i32
    return %arg0, %c0_i32 : i32, i32
  }
  func.func @transform_1(%arg0: i32) -> (i32, i32) {
    %c0_i32 = arith.constant 0 : i32
    %c0_i32_0 = arith.constant 0 : i32
    %c0_i32_1 = arith.constant 0 : i32
    return %c0_i32, %c0_i32_0 : i32, i32
  }
  func.func @transform_2(%arg0: i32) -> (i32, i32) {
    %c0_i32 = arith.constant 0 : i32
    %c0_i32_0 = arith.constant 0 : i32
    %c0_i32_1 = arith.constant 0 : i32
    return %c0_i32, %c0_i32_0 : i32, i32
  }
  func.func @transform_3(%arg0: i32) -> (i32, i32) {
    %c0_i32 = arith.constant 0 : i32
    %c0_i32_0 = arith.constant 0 : i32
    %c0_i32_1 = arith.constant 0 : i32
    return %c0_i32, %c0_i32_0 : i32, i32
  }
  func.func @transform_4(%arg0: i32) -> (i32, i32) {
    %c0_i32 = arith.constant 0 : i32
    %c0_i32_0 = arith.constant 0 : i32
    %c0_i32_1 = arith.constant 0 : i32
    return %c0_i32, %c0_i32_0 : i32, i32
  }
  func.func @transform_5(%arg0: i32) -> (i32, i32) {
    %c0_i32 = arith.constant 0 : i32
    %c0_i32_0 = arith.constant 0 : i32
    return %arg0, %c0_i32 : i32, i32
  }
}

module attributes {stable_mosaic.version = 11 : i64} {
  func.func @attn_proj_res_kernel(%arg0: i32, %arg1: memref<1x12x96xbf16, #tpu.memory_space<vmem>>, %arg2: memref<1x12x32xbf16, #tpu.memory_space<vmem>>, %arg3: memref<32x32xbf16, #tpu.memory_space<vmem>>, %arg4: memref<1x32xf32, #tpu.memory_space<vmem>>, %arg5: memref<1x12x32xbf16, #tpu.memory_space<vmem>>) attributes {dimension_semantics = [#tpu.dimension_semantics<parallel>], iteration_bounds = array<i64: 2>, scalar_prefetch = 0 : i64, scratch_operands = 0 : i64, tpu.core_type = #tpu.core_type<tc>, window_params = [{transform_indices = @transform_0, window_bounds = array<i64: 1, 12, 96>}, {transform_indices = @transform_1, window_bounds = array<i64: 1, 12, 32>}, {pipeline_mode = #tpu.pipeline_mode<synchronous>, transform_indices = @transform_2, window_bounds = array<i64: 32, 32>}, {pipeline_mode = #tpu.pipeline_mode<synchronous>, transform_indices = @transform_3, window_bounds = array<i64: 1, 32>}, {transform_indices = @transform_4, window_bounds = array<i64: 1, 12, 32>}]} {
    %c0 = arith.constant 0 : index
    %c0_0 = arith.constant 0 : index
    %c0_1 = arith.constant 0 : index
    %0 = vector.load %arg1[%c0, %c0_0, %c0_1] : memref<1x12x96xbf16, #tpu.memory_space<vmem>>, vector<1x12x96xbf16>
    %1 = vector.shape_cast %0 : vector<1x12x96xbf16> to vector<12x96xbf16>
    %2 = arith.extf %1 : vector<12x96xbf16> to vector<12x96xf32>
    %3 = vector.extract_strided_slice %2 {offsets = [0, 0], sizes = [12, 4], strides = [1, 1]} : vector<12x96xf32> to vector<12x4xf32>
    %4 = vector.extract_strided_slice %2 {offsets = [0, 32], sizes = [12, 4], strides = [1, 1]} : vector<12x96xf32> to vector<12x4xf32>
    %5 = vector.extract_strided_slice %2 {offsets = [0, 64], sizes = [12, 4], strides = [1, 1]} : vector<12x96xf32> to vector<12x4xf32>
    %cst = arith.constant dense<0.000000e+00> : vector<12x12xf32>
    %6 = tpu.matmul %3, %4, %cst {dimension_numbers = #tpu.dot_dimension_numbers<[1], [1], [0], [0], [0, 0, 1, 0], [], []>} : vector<12x4xf32>, vector<12x4xf32>, vector<12x12xf32> -> vector<12x12xf32>
    %cst_2 = arith.constant 5.000000e-01 : f32
    %7 = vector.broadcast %cst_2 : f32 to vector<12x12xf32>
    %8 = arith.mulf %6, %7 : vector<12x12xf32>
    %cst_3 = arith.constant dense<0xFF800000> : vector<12xf32>
    %9 = vector.multi_reduction <maximumf>, %8, %cst_3 [1] : vector<12x12xf32> to vector<12xf32>
    %10 = vector.shape_cast %9 : vector<12xf32> to vector<12x1xf32>
    %11 = vector.broadcast %10 : vector<12x1xf32> to vector<12x12xf32>
    %12 = arith.subf %8, %11 : vector<12x12xf32>
    %13 = math.exp %12 : vector<12x12xf32>
    %cst_4 = arith.constant dense<0.000000e+00> : vector<12xf32>
    %14 = vector.multi_reduction <add>, %13, %cst_4 [1] : vector<12x12xf32> to vector<12xf32>
    %15 = vector.shape_cast %14 : vector<12xf32> to vector<12x1xf32>
    %16 = tpu.reciprocal %15 {approx = true} : vector<12x1xf32> -> vector<12x1xf32>
    %17 = vector.broadcast %16 : vector<12x1xf32> to vector<12x12xf32>
    %18 = arith.mulf %13, %17 : vector<12x12xf32>
    %cst_5 = arith.constant dense<0.000000e+00> : vector<12x4xf32>
    %19 = tpu.matmul %18, %5, %cst_5 {dimension_numbers = #tpu.dot_dimension_numbers<[1], [0], [0], [1], [0, 0, 1, 1], [], []>} : vector<12x12xf32>, vector<12x4xf32>, vector<12x4xf32> -> vector<12x4xf32>
    %20 = vector.extract_strided_slice %2 {offsets = [0, 4], sizes = [12, 4], strides = [1, 1]} : vector<12x96xf32> to vector<12x4xf32>
    %21 = vector.extract_strided_slice %2 {offsets = [0, 36], sizes = [12, 4], strides = [1, 1]} : vector<12x96xf32> to vector<12x4xf32>
    %22 = vector.extract_strided_slice %2 {offsets = [0, 68], sizes = [12, 4], strides = [1, 1]} : vector<12x96xf32> to vector<12x4xf32>
    %cst_6 = arith.constant dense<0.000000e+00> : vector<12x12xf32>
    %23 = tpu.matmul %20, %21, %cst_6 {dimension_numbers = #tpu.dot_dimension_numbers<[1], [1], [0], [0], [0, 0, 1, 0], [], []>} : vector<12x4xf32>, vector<12x4xf32>, vector<12x12xf32> -> vector<12x12xf32>
    %cst_7 = arith.constant 5.000000e-01 : f32
    %24 = vector.broadcast %cst_7 : f32 to vector<12x12xf32>
    %25 = arith.mulf %23, %24 : vector<12x12xf32>
    %cst_8 = arith.constant dense<0xFF800000> : vector<12xf32>
    %26 = vector.multi_reduction <maximumf>, %25, %cst_8 [1] : vector<12x12xf32> to vector<12xf32>
    %27 = vector.shape_cast %26 : vector<12xf32> to vector<12x1xf32>
    %28 = vector.broadcast %27 : vector<12x1xf32> to vector<12x12xf32>
    %29 = arith.subf %25, %28 : vector<12x12xf32>
    %30 = math.exp %29 : vector<12x12xf32>
    %cst_9 = arith.constant dense<0.000000e+00> : vector<12xf32>
    %31 = vector.multi_reduction <add>, %30, %cst_9 [1] : vector<12x12xf32> to vector<12xf32>
    %32 = vector.shape_cast %31 : vector<12xf32> to vector<12x1xf32>
    %33 = tpu.reciprocal %32 {approx = true} : vector<12x1xf32> -> vector<12x1xf32>
    %34 = vector.broadcast %33 : vector<12x1xf32> to vector<12x12xf32>
    %35 = arith.mulf %30, %34 : vector<12x12xf32>
    %cst_10 = arith.constant dense<0.000000e+00> : vector<12x4xf32>
    %36 = tpu.matmul %35, %22, %cst_10 {dimension_numbers = #tpu.dot_dimension_numbers<[1], [0], [0], [1], [0, 0, 1, 1], [], []>} : vector<12x12xf32>, vector<12x4xf32>, vector<12x4xf32> -> vector<12x4xf32>
    %37 = vector.extract_strided_slice %2 {offsets = [0, 8], sizes = [12, 4], strides = [1, 1]} : vector<12x96xf32> to vector<12x4xf32>
    %38 = vector.extract_strided_slice %2 {offsets = [0, 40], sizes = [12, 4], strides = [1, 1]} : vector<12x96xf32> to vector<12x4xf32>
    %39 = vector.extract_strided_slice %2 {offsets = [0, 72], sizes = [12, 4], strides = [1, 1]} : vector<12x96xf32> to vector<12x4xf32>
    %cst_11 = arith.constant dense<0.000000e+00> : vector<12x12xf32>
    %40 = tpu.matmul %37, %38, %cst_11 {dimension_numbers = #tpu.dot_dimension_numbers<[1], [1], [0], [0], [0, 0, 1, 0], [], []>} : vector<12x4xf32>, vector<12x4xf32>, vector<12x12xf32> -> vector<12x12xf32>
    %cst_12 = arith.constant 5.000000e-01 : f32
    %41 = vector.broadcast %cst_12 : f32 to vector<12x12xf32>
    %42 = arith.mulf %40, %41 : vector<12x12xf32>
    %cst_13 = arith.constant dense<0xFF800000> : vector<12xf32>
    %43 = vector.multi_reduction <maximumf>, %42, %cst_13 [1] : vector<12x12xf32> to vector<12xf32>
    %44 = vector.shape_cast %43 : vector<12xf32> to vector<12x1xf32>
    %45 = vector.broadcast %44 : vector<12x1xf32> to vector<12x12xf32>
    %46 = arith.subf %42, %45 : vector<12x12xf32>
    %47 = math.exp %46 : vector<12x12xf32>
    %cst_14 = arith.constant dense<0.000000e+00> : vector<12xf32>
    %48 = vector.multi_reduction <add>, %47, %cst_14 [1] : vector<12x12xf32> to vector<12xf32>
    %49 = vector.shape_cast %48 : vector<12xf32> to vector<12x1xf32>
    %50 = tpu.reciprocal %49 {approx = true} : vector<12x1xf32> -> vector<12x1xf32>
    %51 = vector.broadcast %50 : vector<12x1xf32> to vector<12x12xf32>
    %52 = arith.mulf %47, %51 : vector<12x12xf32>
    %cst_15 = arith.constant dense<0.000000e+00> : vector<12x4xf32>
    %53 = tpu.matmul %52, %39, %cst_15 {dimension_numbers = #tpu.dot_dimension_numbers<[1], [0], [0], [1], [0, 0, 1, 1], [], []>} : vector<12x12xf32>, vector<12x4xf32>, vector<12x4xf32> -> vector<12x4xf32>
    %54 = vector.extract_strided_slice %2 {offsets = [0, 12], sizes = [12, 4], strides = [1, 1]} : vector<12x96xf32> to vector<12x4xf32>
    %55 = vector.extract_strided_slice %2 {offsets = [0, 44], sizes = [12, 4], strides = [1, 1]} : vector<12x96xf32> to vector<12x4xf32>
    %56 = vector.extract_strided_slice %2 {offsets = [0, 76], sizes = [12, 4], strides = [1, 1]} : vector<12x96xf32> to vector<12x4xf32>
    %cst_16 = arith.constant dense<0.000000e+00> : vector<12x12xf32>
    %57 = tpu.matmul %54, %55, %cst_16 {dimension_numbers = #tpu.dot_dimension_numbers<[1], [1], [0], [0], [0, 0, 1, 0], [], []>} : vector<12x4xf32>, vector<12x4xf32>, vector<12x12xf32> -> vector<12x12xf32>
    %cst_17 = arith.constant 5.000000e-01 : f32
    %58 = vector.broadcast %cst_17 : f32 to vector<12x12xf32>
    %59 = arith.mulf %57, %58 : vector<12x12xf32>
    %cst_18 = arith.constant dense<0xFF800000> : vector<12xf32>
    %60 = vector.multi_reduction <maximumf>, %59, %cst_18 [1] : vector<12x12xf32> to vector<12xf32>
    %61 = vector.shape_cast %60 : vector<12xf32> to vector<12x1xf32>
    %62 = vector.broadcast %61 : vector<12x1xf32> to vector<12x12xf32>
    %63 = arith.subf %59, %62 : vector<12x12xf32>
    %64 = math.exp %63 : vector<12x12xf32>
    %cst_19 = arith.constant dense<0.000000e+00> : vector<12xf32>
    %65 = vector.multi_reduction <add>, %64, %cst_19 [1] : vector<12x12xf32> to vector<12xf32>
    %66 = vector.shape_cast %65 : vector<12xf32> to vector<12x1xf32>
    %67 = tpu.reciprocal %66 {approx = true} : vector<12x1xf32> -> vector<12x1xf32>
    %68 = vector.broadcast %67 : vector<12x1xf32> to vector<12x12xf32>
    %69 = arith.mulf %64, %68 : vector<12x12xf32>
    %cst_20 = arith.constant dense<0.000000e+00> : vector<12x4xf32>
    %70 = tpu.matmul %69, %56, %cst_20 {dimension_numbers = #tpu.dot_dimension_numbers<[1], [0], [0], [1], [0, 0, 1, 1], [], []>} : vector<12x12xf32>, vector<12x4xf32>, vector<12x4xf32> -> vector<12x4xf32>
    %71 = vector.extract_strided_slice %2 {offsets = [0, 16], sizes = [12, 4], strides = [1, 1]} : vector<12x96xf32> to vector<12x4xf32>
    %72 = vector.extract_strided_slice %2 {offsets = [0, 48], sizes = [12, 4], strides = [1, 1]} : vector<12x96xf32> to vector<12x4xf32>
    %73 = vector.extract_strided_slice %2 {offsets = [0, 80], sizes = [12, 4], strides = [1, 1]} : vector<12x96xf32> to vector<12x4xf32>
    %cst_21 = arith.constant dense<0.000000e+00> : vector<12x12xf32>
    %74 = tpu.matmul %71, %72, %cst_21 {dimension_numbers = #tpu.dot_dimension_numbers<[1], [1], [0], [0], [0, 0, 1, 0], [], []>} : vector<12x4xf32>, vector<12x4xf32>, vector<12x12xf32> -> vector<12x12xf32>
    %cst_22 = arith.constant 5.000000e-01 : f32
    %75 = vector.broadcast %cst_22 : f32 to vector<12x12xf32>
    %76 = arith.mulf %74, %75 : vector<12x12xf32>
    %cst_23 = arith.constant dense<0xFF800000> : vector<12xf32>
    %77 = vector.multi_reduction <maximumf>, %76, %cst_23 [1] : vector<12x12xf32> to vector<12xf32>
    %78 = vector.shape_cast %77 : vector<12xf32> to vector<12x1xf32>
    %79 = vector.broadcast %78 : vector<12x1xf32> to vector<12x12xf32>
    %80 = arith.subf %76, %79 : vector<12x12xf32>
    %81 = math.exp %80 : vector<12x12xf32>
    %cst_24 = arith.constant dense<0.000000e+00> : vector<12xf32>
    %82 = vector.multi_reduction <add>, %81, %cst_24 [1] : vector<12x12xf32> to vector<12xf32>
    %83 = vector.shape_cast %82 : vector<12xf32> to vector<12x1xf32>
    %84 = tpu.reciprocal %83 {approx = true} : vector<12x1xf32> -> vector<12x1xf32>
    %85 = vector.broadcast %84 : vector<12x1xf32> to vector<12x12xf32>
    %86 = arith.mulf %81, %85 : vector<12x12xf32>
    %cst_25 = arith.constant dense<0.000000e+00> : vector<12x4xf32>
    %87 = tpu.matmul %86, %73, %cst_25 {dimension_numbers = #tpu.dot_dimension_numbers<[1], [0], [0], [1], [0, 0, 1, 1], [], []>} : vector<12x12xf32>, vector<12x4xf32>, vector<12x4xf32> -> vector<12x4xf32>
    %88 = vector.extract_strided_slice %2 {offsets = [0, 20], sizes = [12, 4], strides = [1, 1]} : vector<12x96xf32> to vector<12x4xf32>
    %89 = vector.extract_strided_slice %2 {offsets = [0, 52], sizes = [12, 4], strides = [1, 1]} : vector<12x96xf32> to vector<12x4xf32>
    %90 = vector.extract_strided_slice %2 {offsets = [0, 84], sizes = [12, 4], strides = [1, 1]} : vector<12x96xf32> to vector<12x4xf32>
    %cst_26 = arith.constant dense<0.000000e+00> : vector<12x12xf32>
    %91 = tpu.matmul %88, %89, %cst_26 {dimension_numbers = #tpu.dot_dimension_numbers<[1], [1], [0], [0], [0, 0, 1, 0], [], []>} : vector<12x4xf32>, vector<12x4xf32>, vector<12x12xf32> -> vector<12x12xf32>
    %cst_27 = arith.constant 5.000000e-01 : f32
    %92 = vector.broadcast %cst_27 : f32 to vector<12x12xf32>
    %93 = arith.mulf %91, %92 : vector<12x12xf32>
    %cst_28 = arith.constant dense<0xFF800000> : vector<12xf32>
    %94 = vector.multi_reduction <maximumf>, %93, %cst_28 [1] : vector<12x12xf32> to vector<12xf32>
    %95 = vector.shape_cast %94 : vector<12xf32> to vector<12x1xf32>
    %96 = vector.broadcast %95 : vector<12x1xf32> to vector<12x12xf32>
    %97 = arith.subf %93, %96 : vector<12x12xf32>
    %98 = math.exp %97 : vector<12x12xf32>
    %cst_29 = arith.constant dense<0.000000e+00> : vector<12xf32>
    %99 = vector.multi_reduction <add>, %98, %cst_29 [1] : vector<12x12xf32> to vector<12xf32>
    %100 = vector.shape_cast %99 : vector<12xf32> to vector<12x1xf32>
    %101 = tpu.reciprocal %100 {approx = true} : vector<12x1xf32> -> vector<12x1xf32>
    %102 = vector.broadcast %101 : vector<12x1xf32> to vector<12x12xf32>
    %103 = arith.mulf %98, %102 : vector<12x12xf32>
    %cst_30 = arith.constant dense<0.000000e+00> : vector<12x4xf32>
    %104 = tpu.matmul %103, %90, %cst_30 {dimension_numbers = #tpu.dot_dimension_numbers<[1], [0], [0], [1], [0, 0, 1, 1], [], []>} : vector<12x12xf32>, vector<12x4xf32>, vector<12x4xf32> -> vector<12x4xf32>
    %105 = vector.extract_strided_slice %2 {offsets = [0, 24], sizes = [12, 4], strides = [1, 1]} : vector<12x96xf32> to vector<12x4xf32>
    %106 = vector.extract_strided_slice %2 {offsets = [0, 56], sizes = [12, 4], strides = [1, 1]} : vector<12x96xf32> to vector<12x4xf32>
    %107 = vector.extract_strided_slice %2 {offsets = [0, 88], sizes = [12, 4], strides = [1, 1]} : vector<12x96xf32> to vector<12x4xf32>
    %cst_31 = arith.constant dense<0.000000e+00> : vector<12x12xf32>
    %108 = tpu.matmul %105, %106, %cst_31 {dimension_numbers = #tpu.dot_dimension_numbers<[1], [1], [0], [0], [0, 0, 1, 0], [], []>} : vector<12x4xf32>, vector<12x4xf32>, vector<12x12xf32> -> vector<12x12xf32>
    %cst_32 = arith.constant 5.000000e-01 : f32
    %109 = vector.broadcast %cst_32 : f32 to vector<12x12xf32>
    %110 = arith.mulf %108, %109 : vector<12x12xf32>
    %cst_33 = arith.constant dense<0xFF800000> : vector<12xf32>
    %111 = vector.multi_reduction <maximumf>, %110, %cst_33 [1] : vector<12x12xf32> to vector<12xf32>
    %112 = vector.shape_cast %111 : vector<12xf32> to vector<12x1xf32>
    %113 = vector.broadcast %112 : vector<12x1xf32> to vector<12x12xf32>
    %114 = arith.subf %110, %113 : vector<12x12xf32>
    %115 = math.exp %114 : vector<12x12xf32>
    %cst_34 = arith.constant dense<0.000000e+00> : vector<12xf32>
    %116 = vector.multi_reduction <add>, %115, %cst_34 [1] : vector<12x12xf32> to vector<12xf32>
    %117 = vector.shape_cast %116 : vector<12xf32> to vector<12x1xf32>
    %118 = tpu.reciprocal %117 {approx = true} : vector<12x1xf32> -> vector<12x1xf32>
    %119 = vector.broadcast %118 : vector<12x1xf32> to vector<12x12xf32>
    %120 = arith.mulf %115, %119 : vector<12x12xf32>
    %cst_35 = arith.constant dense<0.000000e+00> : vector<12x4xf32>
    %121 = tpu.matmul %120, %107, %cst_35 {dimension_numbers = #tpu.dot_dimension_numbers<[1], [0], [0], [1], [0, 0, 1, 1], [], []>} : vector<12x12xf32>, vector<12x4xf32>, vector<12x4xf32> -> vector<12x4xf32>
    %122 = vector.extract_strided_slice %2 {offsets = [0, 28], sizes = [12, 4], strides = [1, 1]} : vector<12x96xf32> to vector<12x4xf32>
    %123 = vector.extract_strided_slice %2 {offsets = [0, 60], sizes = [12, 4], strides = [1, 1]} : vector<12x96xf32> to vector<12x4xf32>
    %124 = vector.extract_strided_slice %2 {offsets = [0, 92], sizes = [12, 4], strides = [1, 1]} : vector<12x96xf32> to vector<12x4xf32>
    %cst_36 = arith.constant dense<0.000000e+00> : vector<12x12xf32>
    %125 = tpu.matmul %122, %123, %cst_36 {dimension_numbers = #tpu.dot_dimension_numbers<[1], [1], [0], [0], [0, 0, 1, 0], [], []>} : vector<12x4xf32>, vector<12x4xf32>, vector<12x12xf32> -> vector<12x12xf32>
    %cst_37 = arith.constant 5.000000e-01 : f32
    %126 = vector.broadcast %cst_37 : f32 to vector<12x12xf32>
    %127 = arith.mulf %125, %126 : vector<12x12xf32>
    %cst_38 = arith.constant dense<0xFF800000> : vector<12xf32>
    %128 = vector.multi_reduction <maximumf>, %127, %cst_38 [1] : vector<12x12xf32> to vector<12xf32>
    %129 = vector.shape_cast %128 : vector<12xf32> to vector<12x1xf32>
    %130 = vector.broadcast %129 : vector<12x1xf32> to vector<12x12xf32>
    %131 = arith.subf %127, %130 : vector<12x12xf32>
    %132 = math.exp %131 : vector<12x12xf32>
    %cst_39 = arith.constant dense<0.000000e+00> : vector<12xf32>
    %133 = vector.multi_reduction <add>, %132, %cst_39 [1] : vector<12x12xf32> to vector<12xf32>
    %134 = vector.shape_cast %133 : vector<12xf32> to vector<12x1xf32>
    %135 = tpu.reciprocal %134 {approx = true} : vector<12x1xf32> -> vector<12x1xf32>
    %136 = vector.broadcast %135 : vector<12x1xf32> to vector<12x12xf32>
    %137 = arith.mulf %132, %136 : vector<12x12xf32>
    %cst_40 = arith.constant dense<0.000000e+00> : vector<12x4xf32>
    %138 = tpu.matmul %137, %124, %cst_40 {dimension_numbers = #tpu.dot_dimension_numbers<[1], [0], [0], [1], [0, 0, 1, 1], [], []>} : vector<12x12xf32>, vector<12x4xf32>, vector<12x4xf32> -> vector<12x4xf32>
    %139 = tpu.concatenate %19, %36, %53, %70, %87, %104, %121, %138 in 1 : vector<12x4xf32>, vector<12x4xf32>, vector<12x4xf32>, vector<12x4xf32>, vector<12x4xf32>, vector<12x4xf32>, vector<12x4xf32>, vector<12x4xf32> -> vector<12x32xf32>
    %140 = arith.truncf %139 : vector<12x32xf32> to vector<12x32xbf16>
    %c0_41 = arith.constant 0 : index
    %c0_42 = arith.constant 0 : index
    %141 = vector.load %arg3[%c0_41, %c0_42] : memref<32x32xbf16, #tpu.memory_space<vmem>>, vector<32x32xbf16>
    %cst_43 = arith.constant dense<0.000000e+00> : vector<12x32xf32>
    %142 = tpu.matmul %140, %141, %cst_43 {dimension_numbers = #tpu.dot_dimension_numbers<[1], [0], [0], [1], [0, 0, 1, 1], [], []>} : vector<12x32xbf16>, vector<32x32xbf16>, vector<12x32xf32> -> vector<12x32xf32>
    %c0_44 = arith.constant 0 : index
    %c0_45 = arith.constant 0 : index
    %143 = vector.load %arg4[%c0_44, %c0_45] : memref<1x32xf32, #tpu.memory_space<vmem>>, vector<1x32xf32>
    %144 = vector.broadcast %143 : vector<1x32xf32> to vector<12x32xf32>
    %145 = arith.addf %142, %144 : vector<12x32xf32>
    %c0_46 = arith.constant 0 : index
    %c0_47 = arith.constant 0 : index
    %c0_48 = arith.constant 0 : index
    %146 = vector.load %arg2[%c0_46, %c0_47, %c0_48] : memref<1x12x32xbf16, #tpu.memory_space<vmem>>, vector<1x12x32xbf16>
    %147 = vector.shape_cast %146 : vector<1x12x32xbf16> to vector<12x32xbf16>
    %148 = arith.extf %147 : vector<12x32xbf16> to vector<12x32xf32>
    %149 = arith.addf %148, %145 : vector<12x32xf32>
    %150 = arith.truncf %149 : vector<12x32xf32> to vector<12x32xbf16>
    %c0_49 = arith.constant 0 : index
    %c0_50 = arith.constant 0 : index
    %c0_51 = arith.constant 0 : index
    %151 = vector.load %arg5[%c0_49, %c0_50, %c0_51] : memref<1x12x32xbf16, #tpu.memory_space<vmem>>, vector<1x12x32xbf16>
    %152 = vector.shape_cast %151 : vector<1x12x32xbf16> to vector<12x32xbf16>
    %153 = vector.shape_cast %150 : vector<12x32xbf16> to vector<1x12x32xbf16>
    tpu.vector_store %arg5[%c0_49, %c0_50, %c0_51], %153 {strides = array<i32>} : memref<1x12x32xbf16, #tpu.memory_space<vmem>>, vector<1x12x32xbf16>,
    return
  }
  func.func @transform_0(%arg0: i32) -> (i32, i32, i32) {
    %c0_i32 = arith.constant 0 : i32
    %c0_i32_0 = arith.constant 0 : i32
    %c0_i32_1 = arith.constant 0 : i32
    return %arg0, %c0_i32, %c0_i32_0 : i32, i32, i32
  }
  func.func @transform_1(%arg0: i32) -> (i32, i32, i32) {
    %c0_i32 = arith.constant 0 : i32
    %c0_i32_0 = arith.constant 0 : i32
    %c0_i32_1 = arith.constant 0 : i32
    return %arg0, %c0_i32, %c0_i32_0 : i32, i32, i32
  }
  func.func @transform_2(%arg0: i32) -> (i32, i32) {
    %c0_i32 = arith.constant 0 : i32
    %c0_i32_0 = arith.constant 0 : i32
    %c0_i32_1 = arith.constant 0 : i32
    return %c0_i32, %c0_i32_0 : i32, i32
  }
  func.func @transform_3(%arg0: i32) -> (i32, i32) {
    %c0_i32 = arith.constant 0 : i32
    %c0_i32_0 = arith.constant 0 : i32
    %c0_i32_1 = arith.constant 0 : i32
    return %c0_i32, %c0_i32_0 : i32, i32
  }
  func.func @transform_4(%arg0: i32) -> (i32, i32, i32) {
    %c0_i32 = arith.constant 0 : i32
    %c0_i32_0 = arith.constant 0 : i32
    %c0_i32_1 = arith.constant 0 : i32
    return %arg0, %c0_i32, %c0_i32_0 : i32, i32, i32
  }
}

module attributes {stable_mosaic.version = 11 : i64} {
  func.func @mlp_block_kernel(%arg0: i32, %arg1: memref<24x32xbf16, #tpu.memory_space<vmem>>, %arg2: memref<1x32xf32, #tpu.memory_space<vmem>>, %arg3: memref<1x32xf32, #tpu.memory_space<vmem>>, %arg4: memref<32x64xbf16, #tpu.memory_space<vmem>>, %arg5: memref<1x64xf32, #tpu.memory_space<vmem>>, %arg6: memref<64x32xbf16, #tpu.memory_space<vmem>>, %arg7: memref<1x32xf32, #tpu.memory_space<vmem>>, %arg8: memref<24x32xbf16, #tpu.memory_space<vmem>>) attributes {dimension_semantics = [#tpu.dimension_semantics<parallel>], iteration_bounds = array<i64: 1>, scalar_prefetch = 0 : i64, scratch_operands = 0 : i64, tpu.core_type = #tpu.core_type<tc>, window_params = [{transform_indices = @transform_0, window_bounds = array<i64: 24, 32>}, {pipeline_mode = #tpu.pipeline_mode<synchronous>, transform_indices = @transform_1, window_bounds = array<i64: 1, 32>}, {pipeline_mode = #tpu.pipeline_mode<synchronous>, transform_indices = @transform_2, window_bounds = array<i64: 1, 32>}, {pipeline_mode = #tpu.pipeline_mode<synchronous>, transform_indices = @transform_3, window_bounds = array<i64: 32, 64>}, {pipeline_mode = #tpu.pipeline_mode<synchronous>, transform_indices = @transform_4, window_bounds = array<i64: 1, 64>}, {pipeline_mode = #tpu.pipeline_mode<synchronous>, transform_indices = @transform_5, window_bounds = array<i64: 64, 32>}, {pipeline_mode = #tpu.pipeline_mode<synchronous>, transform_indices = @transform_6, window_bounds = array<i64: 1, 32>}, {transform_indices = @transform_7, window_bounds = array<i64: 24, 32>}]} {
    %c0 = arith.constant 0 : index
    %c0_0 = arith.constant 0 : index
    %0 = vector.load %arg1[%c0, %c0_0] : memref<24x32xbf16, #tpu.memory_space<vmem>>, vector<24x32xbf16>
    %1 = arith.extf %0 : vector<24x32xbf16> to vector<24x32xf32>
    %cst = arith.constant dense<0.000000e+00> : vector<24xf32>
    %2 = vector.multi_reduction <add>, %1, %cst [1] : vector<24x32xf32> to vector<24xf32>
    %3 = vector.shape_cast %2 : vector<24xf32> to vector<24x1xf32>
    %cst_1 = arith.constant 3.200000e+01 : f32
    %4 = vector.broadcast %cst_1 : f32 to vector<24x1xf32>
    %5 = arith.divf %3, %4 : vector<24x1xf32>
    %6 = vector.broadcast %5 : vector<24x1xf32> to vector<24x32xf32>
    %7 = arith.subf %1, %6 : vector<24x32xf32>
    %8 = arith.mulf %7, %7 : vector<24x32xf32>
    %cst_2 = arith.constant dense<0.000000e+00> : vector<24xf32>
    %9 = vector.multi_reduction <add>, %8, %cst_2 [1] : vector<24x32xf32> to vector<24xf32>
    %10 = vector.shape_cast %9 : vector<24xf32> to vector<24x1xf32>
    %cst_3 = arith.constant 3.200000e+01 : f32
    %11 = vector.broadcast %cst_3 : f32 to vector<24x1xf32>
    %12 = arith.divf %10, %11 : vector<24x1xf32>
    %13 = vector.broadcast %5 : vector<24x1xf32> to vector<24x32xf32>
    %14 = arith.subf %1, %13 : vector<24x32xf32>
    %cst_4 = arith.constant 9.99999974E-6 : f32
    %15 = vector.broadcast %cst_4 : f32 to vector<24x1xf32>
    %16 = arith.addf %12, %15 : vector<24x1xf32>
    %17 = math.rsqrt %16 : vector<24x1xf32>
    %18 = vector.broadcast %17 : vector<24x1xf32> to vector<24x32xf32>
    %19 = arith.mulf %14, %18 : vector<24x32xf32>
    %c0_5 = arith.constant 0 : index
    %c0_6 = arith.constant 0 : index
    %20 = vector.load %arg2[%c0_5, %c0_6] : memref<1x32xf32, #tpu.memory_space<vmem>>, vector<1x32xf32>
    %21 = vector.broadcast %20 : vector<1x32xf32> to vector<24x32xf32>
    %22 = arith.mulf %19, %21 : vector<24x32xf32>
    %c0_7 = arith.constant 0 : index
    %c0_8 = arith.constant 0 : index
    %23 = vector.load %arg3[%c0_7, %c0_8] : memref<1x32xf32, #tpu.memory_space<vmem>>, vector<1x32xf32>
    %24 = vector.broadcast %23 : vector<1x32xf32> to vector<24x32xf32>
    %25 = arith.addf %22, %24 : vector<24x32xf32>
    %26 = arith.truncf %25 : vector<24x32xf32> to vector<24x32xbf16>
    %c0_9 = arith.constant 0 : index
    %c0_10 = arith.constant 0 : index
    %27 = vector.load %arg4[%c0_9, %c0_10] : memref<32x64xbf16, #tpu.memory_space<vmem>>, vector<32x64xbf16>
    %cst_11 = arith.constant dense<0.000000e+00> : vector<24x64xf32>
    %28 = tpu.matmul %26, %27, %cst_11 {dimension_numbers = #tpu.dot_dimension_numbers<[1], [0], [0], [1], [0, 0, 1, 1], [], []>} : vector<24x32xbf16>, vector<32x64xbf16>, vector<24x64xf32> -> vector<24x64xf32>
    %c0_12 = arith.constant 0 : index
    %c0_13 = arith.constant 0 : index
    %29 = vector.load %arg5[%c0_12, %c0_13] : memref<1x64xf32, #tpu.memory_space<vmem>>, vector<1x64xf32>
    %30 = vector.broadcast %29 : vector<1x64xf32> to vector<24x64xf32>
    %31 = arith.addf %28, %30 : vector<24x64xf32>
    %cst_14 = arith.constant 0.000000e+00 : f32
    %32 = vector.broadcast %cst_14 : f32 to vector<24x64xf32>
    %33 = arith.maximumf %31, %32 : vector<24x64xf32>
    %34 = arith.truncf %33 : vector<24x64xf32> to vector<24x64xbf16>
    %c0_15 = arith.constant 0 : index
    %c0_16 = arith.constant 0 : index
    %35 = vector.load %arg6[%c0_15, %c0_16] : memref<64x32xbf16, #tpu.memory_space<vmem>>, vector<64x32xbf16>
    %cst_17 = arith.constant dense<0.000000e+00> : vector<24x32xf32>
    %36 = tpu.matmul %34, %35, %cst_17 {dimension_numbers = #tpu.dot_dimension_numbers<[1], [0], [0], [1], [0, 0, 1, 1], [], []>} : vector<24x64xbf16>, vector<64x32xbf16>, vector<24x32xf32> -> vector<24x32xf32>
    %c0_18 = arith.constant 0 : index
    %c0_19 = arith.constant 0 : index
    %37 = vector.load %arg7[%c0_18, %c0_19] : memref<1x32xf32, #tpu.memory_space<vmem>>, vector<1x32xf32>
    %38 = vector.broadcast %37 : vector<1x32xf32> to vector<24x32xf32>
    %39 = arith.addf %36, %38 : vector<24x32xf32>
    %40 = arith.addf %1, %39 : vector<24x32xf32>
    %41 = arith.truncf %40 : vector<24x32xf32> to vector<24x32xbf16>
    %c0_20 = arith.constant 0 : index
    %c0_21 = arith.constant 0 : index
    %42 = vector.load %arg8[%c0_20, %c0_21] : memref<24x32xbf16, #tpu.memory_space<vmem>>, vector<24x32xbf16>
    tpu.vector_store %arg8[%c0_20, %c0_21], %41 {strides = array<i32>} : memref<24x32xbf16, #tpu.memory_space<vmem>>, vector<24x32xbf16>,
    return
  }
  func.func @transform_0(%arg0: i32) -> (i32, i32) {
    %c0_i32 = arith.constant 0 : i32
    %c0_i32_0 = arith.constant 0 : i32
    return %arg0, %c0_i32 : i32, i32
  }
  func.func @transform_1(%arg0: i32) -> (i32, i32) {
    %c0_i32 = arith.constant 0 : i32
    %c0_i32_0 = arith.constant 0 : i32
    %c0_i32_1 = arith.constant 0 : i32
    return %c0_i32, %c0_i32_0 : i32, i32
  }
  func.func @transform_2(%arg0: i32) -> (i32, i32) {
    %c0_i32 = arith.constant 0 : i32
    %c0_i32_0 = arith.constant 0 : i32
    %c0_i32_1 = arith.constant 0 : i32
    return %c0_i32, %c0_i32_0 : i32, i32
  }
  func.func @transform_3(%arg0: i32) -> (i32, i32) {
    %c0_i32 = arith.constant 0 : i32
    %c0_i32_0 = arith.constant 0 : i32
    %c0_i32_1 = arith.constant 0 : i32
    return %c0_i32, %c0_i32_0 : i32, i32
  }
  func.func @transform_4(%arg0: i32) -> (i32, i32) {
    %c0_i32 = arith.constant 0 : i32
    %c0_i32_0 = arith.constant 0 : i32
    %c0_i32_1 = arith.constant 0 : i32
    return %c0_i32, %c0_i32_0 : i32, i32
  }
  func.func @transform_5(%arg0: i32) -> (i32, i32) {
    %c0_i32 = arith.constant 0 : i32
    %c0_i32_0 = arith.constant 0 : i32
    %c0_i32_1 = arith.constant 0 : i32
    return %c0_i32, %c0_i32_0 : i32, i32
  }
  func.func @transform_6(%arg0: i32) -> (i32, i32) {
    %c0_i32 = arith.constant 0 : i32
    %c0_i32_0 = arith.constant 0 : i32
    %c0_i32_1 = arith.constant 0 : i32
    return %c0_i32, %c0_i32_0 : i32, i32
  }
  func.func @transform_7(%arg0: i32) -> (i32, i32) {
    %c0_i32 = arith.constant 0 : i32
    %c0_i32_0 = arith.constant 0 : i32
    return %arg0, %c0_i32 : i32, i32
  }
}

</mosaic_0001>

<bundles_post_ra>
// kernel: mapping_network_forward.7
= control target key start
LH: loop header
LB: loop body
LE: loop exit
PB: predicated region body
PF: predicated region fallthrough
CT: control target
= control target key end

     0   :  { %s547_s15 = smov 0   ;;  %s549_s16 = smov 0   ;;  %s612_s0 = inlined_call_operand.vmem [shape: bf16[2,8,128], index: 0, kind: input, shape index: {}]   ;;  %s613_s1 = inlined_call_operand.vmem [shape: bf16[128,32], index: 1, kind: input, shape index: {}]   ;;  %s614_s2 = inlined_call_operand.vmem [shape: f32[1,32], index: 2, kind: input, shape index: {}]   ;;  %s615_s3 = inlined_call_operand.vmem [shape: f32[8,32], index: 3, kind: input, shape index: {}]   ;;  %s616_s4 = inlined_call_operand.vmem [shape: bf16[2,8,32], index: 4, kind: output, shape index: {}]  }
   0x1   :  { %s551_s17 = smov 0  }
   0x2 LB: > { %s26_s18 = sadd.s32 1, %s515_s16  ;;  %p426_p0 = scmp.ge.s32.totalorder %s519_s17, 1  ;;  %s519_s17 = sphi %s551_s17, %s14_s17   ;;  %s515_s16 = sphi %s549_s16, %s618_s16   ;;  %s511_s15 = sphi %s547_s15, %s617_s15  }
   0x3   : > { %p28_p1 = scmp.ge.s32.totalorder %s26_s18, 2  ;;  %p189_p2 = scmp.lt.s32.totalorder %s519_s17, 3 }
   0x5   : > { %s620_s18 = smov (%p28_p1, %s26_s18), 0  ;;  %p190_p3 = pnand %p426_p0, %p189_p2 }
   0x6   : > { %p221_p4 = scmp.lt.s32.totalorder (!%p190_p3), %s511_s15, 1 }
   0x7   : > { %193 = sbr.rel (%p190_p3) target bundleno = 189 (0xbd), region = 36 }
   0xc   : > { %v470_v0 = vld [vmem:[%s613_s1 + $0x38] sm:$0xff]  ;;  %vm242_vm0 = vcmask 261120   ;;  %v469_v1 = vld [vmem:[%s613_s1 + $0x30] sm:$0xff]  ;;  %v521_v2 = vmov 0.0   ;;  %v468_v3 = vld [vmem:[%s613_s1 + $0x28] sm:$0xff]  ;;  %s622_s15 = smov (!%p221_p4, %s511_s15), 1 }
   0xd   : > { %310 = vmatpush.bf16.msra.mxu0 %v470_v0  ;;  %243 = vst.msk [vmem:[#allocation2] sm:$0xff] %vm242_vm0, %v521_v2  ;;  %v467_v4 = vld [vmem:[%s613_s1 + $0x20] sm:$0xff]  ;;  %v466_v5 = vld [vmem:[%s613_s1 + $0x18] sm:$0xff]  ;;  %v465_v6 = vld [vmem:[%s613_s1 + $0x10] sm:$0xff]  ;;  %s427_s7 = sshll.u32 %s622_s15, 2  ;;  %vm339_vm1 = vcmask 257024  }
   0xe   : > { %v464_v7 = vld [vmem:[%s613_s1 + $0x8] sm:$0xff]  ;;  %v463_v8 = vld [vmem:[%s613_s1] sm:$0xff]  ;;  %s227_s12 = scalar_lea.vmem %s612_s0, %s427_s7  ;;  %s237_s22 = scalar_lea.vmem %s616_s4, %s427_s7 }
   0xf   : > { %v245_v9 = vld [vmem:[%s227_s12] sm:$0xf] }
  0x10   : > { %v496_v13 = vld [vmem:[%s614_s2] ss:$0 sm:$0xff] }
  0x11   : > { %311 = vmatpush.bf16.msra.mxu0 %v469_v1  ;;  %v336_v17 = vld [vmem:[%s615_s3] sm:$0xff] }
  0x14   : > { %v244_v10 = vld [vmem:[#allocation2] sm:$0xff] }
  0x15   : > { %312 = vmatpush.bf16.msra.mxu0 %v468_v3 }
  0x19   : > { %313 = vmatpush.bf16.msra.mxu0 %v467_v4 }
  0x1d   : > { %314 = vmatpush.bf16.msra.mxu0 %v466_v5 }
  0x21   : > { %315 = vmatpush.bf16.msra.mxu0 %v465_v6 }
  0x25   : > { %316 = vmatpush.bf16.msra.mxu0 %v464_v7 }
  0x29   : > { %317 = vmatpush.bf16.msra.mxu0 %v463_v8 }
  0x2c   : > { %318 = vmatmul.bf16.vlgmr.msra.gmra.mxu0 %v245_v9 }
  0xa9   : > { %v319_v11 = vpop.f32.mrf.mxu0 }
  0xaa   : > { %v323_v12 = vadd.f32 %v319_v11, %v244_v10 }
  0xac   : > { %325 = vst.msk [vmem:[#allocation2] sm:$0xff] %vm242_vm0, %v323_v12 }
  0xb1   : > { %v321_v14 = vpop.f32.mrf.mxu0 }
  0xb3   : > { %v329_v15 = vld [vmem:[#allocation2] sm:$0xff] }
  0xb4   : > { %v334_v16 = vadd.f32 %v496_v13, %v329_v15 }
  0xb6   : > { %v335_v18 = vmax.f32 %v334_v16, 0.0 }
  0xb8   : > { %v337_v19 = vadd.f32 %v336_v17, %v335_v18 }
  0xba   : > { %v338_v20 = vpack.c.bf16 %v337_v19, %v337_v19 }
  0xbc   : > { %340 = vst.msk [vmem:[%s237_s22] sm:$0xf] %vm339_vm1, %v338_v20 }
  0xbd PF: > { %s14_s17 = sadd.s32 1, %s519_s17   ;;  %s617_s15 = smov %s515_s16 }
  0xbe   : > { %p11_p5 = scmp.ge.s32.totalorder %s14_s17, 4   ;;  %s618_s16 = smov %s620_s18 }
  0xc0   :  { %13 = sbr.rel (!%p11_p5) target bundleno = 2 (0x2), region = 77 }

// kernel: mapping_network_forward.8
= control target key start
LH: loop header
LB: loop body
LE: loop exit
PB: predicated region body
PF: predicated region fallthrough
CT: control target
= control target key end

     0   :  { %vm27_vm0 = vcmask 261120   ;;  %v202_v8 = vmov 32.0   ;;  %vm164_vm11 = vcmask 781312   ;;  %s276_s0 = inlined_call_operand.vmem [shape: bf16[24,32], index: 0, kind: input, shape index: {}]   ;;  %s277_s1 = inlined_call_operand.vmem [shape: f32[1,32], index: 1, kind: input, shape index: {}]   ;;  %s278_s2 = inlined_call_operand.vmem [shape: f32[1,32], index: 2, kind: input, shape index: {}]   ;;  %s279_s4 = inlined_call_operand.vmem [shape: f32[1,96], index: 4, kind: input, shape index: {}]   ;;  %s280_s3 = inlined_call_operand.vmem [shape: bf16[32,96], index: 3, kind: input, shape index: {}]   ;;  %s281_s5 = inlined_call_operand.vmem [shape: bf16[24,96], index: 5, kind: output, shape index: {}]  }
   0x1   :  { %v185_v0 = vld [vmem:[%s276_s0] sm:$0xff]   ;;  %v23_v1 = vld [vmem:[%s276_s0 + $0x8] sm:$0xf]  ;;  %194 = vrcp.f32 %v202_v8 }
   0x2   :  { %v186_v2 = vunpack.c.l.bf16 %v185_v0  ;;  %v26_v3 = vunpack.c.l.bf16 %v23_v1  ;;  %v187_v6 = vunpack.c.h.bf16 %v185_v0  ;;  %v183_v30 = vld [vmem:[%s280_s3 + $0x8] sm:$0xff]  ;;  %v182_v33 = vld [vmem:[%s280_s3] sm:$0xff] }
   0x3   :  { %149 = vmatpush.bf16.msra.mxu0 %v183_v30  ;;  %188 = vmatpush.bf16.msra.mxu1 %v183_v30  ;;  %v191_v55 = vld [vmem:[%s277_s1] ss:$0 sm:$0xff] }
   0x4   :  { %v28_v4 = vsel %vm27_vm0, %v186_v2, 0.0  ;;  %v34_v5 = vsel %vm27_vm0, %v26_v3, 0.0  ;;  %v31_v7 = vsel %vm27_vm0, %v187_v6, 0.0  ;;  %v192_v62 = vld [vmem:[%s278_s2] ss:$0 sm:$0xff] }
   0x5   :  { %29 = vadd.xlane.f32.xlu0 %v28_v4  ;;  %35 = vadd.xlane.f32.xlu1 %v34_v5 }
   0x7   :  { %v195_v9 = vpop.eup %194  ;;  %150 = vmatpush.bf16.msra.mxu0 %v182_v33  ;;  %189 = vmatpush.bf16.msra.mxu1 %v182_v33 }
   0x8   :  { %v38_v10 = vmul.f32 32.0, %v195_v9  ;;  %vm42_vm1 = vweird.f32 %v195_v9 }
   0xa   :  { %v39_v11 = vsub.f32 1.0, %v38_v10 }
   0xc   :  { %v40_v12 = vmul.f32 %v195_v9, %v39_v11  ;;  %v193_v11 = vld [vmem:[%s279_s4] ss:$0 sm:$0xff] }
   0xd   :  { %32 = vadd.xlane.f32.xlu0 %v31_v7 }
   0xe   :  { %v41_v13 = vadd.f32 %v195_v9, %v40_v12 }
  0x10   :  { %v43_v14 = vsel %vm42_vm1, %v195_v9, %v41_v13 }
  0x78   :  { %v30_v15 = vpop.xlane.xlu0 %29  ;;  %v36_v19 = vpop.xlane.xlu1 %35 }
  0x79   :  { %v44_v16 = vmul.f32 %v43_v14, %v30_v15  ;;  %v46_v23 = vmul.f32 %v43_v14, %v36_v19 }
  0x7b   :  { %v47_v17 = vsub.f32 %v186_v2, %v44_v16  ;;  %v243_v25 = vsub.f32 %v26_v3, %v46_v23 }
  0x7d   :  { %v50_v18 = vmul.f32 %v47_v17, %v47_v17  ;;  %v52_v28 = vmul.f32 %v243_v25, %v243_v25 }
  0x7f   :  { %v53_v20 = vsel %vm27_vm0, %v50_v18, 0.0  ;;  %v59_v29 = vsel %vm27_vm0, %v52_v28, 0.0 }
  0x80   :  { %54 = vadd.xlane.f32.xlu1 %v53_v20  ;;  %v33_v21 = vpop.xlane.xlu0 %32 }
  0x81   :  { %v45_v22 = vmul.f32 %v43_v14, %v33_v21 }
  0x83   :  { %v48_v24 = vsub.f32 %v187_v6, %v45_v22 }
  0x85   :  { %v51_v26 = vmul.f32 %v48_v24, %v48_v24 }
  0x87   :  { %v56_v27 = vsel %vm27_vm0, %v51_v26, 0.0 }
  0x88   :  { %57 = vadd.xlane.f32.xlu2 %v56_v27 }
  0x90   :  { %60 = vadd.xlane.f32.xlu2 %v59_v29 }
  0xf3   :  { %v55_v31 = vpop.xlane.xlu1 %54 }
  0xf4   :  { %v62_v32 = vmul.f32 %v55_v31, %v43_v14 }
  0xf6   :  { %v65_v34 = vadd.f32 1e-05, %v62_v32 }
  0xf8   :  { %196 = vrsqrt.f32 %v65_v34  ;;  %vm74_vm3 = vweird.f32 %v65_v34 }
  0xfb   :  { %v58_v35 = vpop.xlane.xlu2 %57 }
  0xfc   :  { %v63_v36 = vmul.f32 %v58_v35, %v43_v14 }
  0xfe   :  { %v197_v37 = vpop.eup %196  ;;  %v66_v38 = vadd.f32 1e-05, %v63_v36 }
  0xff   :  { %v69_v39 = vmul.f32 %v197_v37, %v65_v34  ;;  %vm75_vm2 = vweird.f32 %v197_v37 }
 0x100   :  { %198 = vrsqrt.f32 %v66_v38  ;;  %vm76_vm4 = vmor %vm74_vm3, %vm75_vm2  ;;  %vm84_vm6 = vweird.f32 %v66_v38 }
 0x101   :  { %v70_v40 = vmul.f32 %v197_v37, %v69_v39 }
 0x103   :  { %v71_v41 = vmul.f32 0.5, %v70_v40  ;;  %v61_v42 = vpop.xlane.xlu2 %60 }
 0x104   :  { %v64_v43 = vmul.f32 %v61_v42, %v43_v14 }
 0x105   :  { %v72_v44 = vsub.f32 1.5, %v71_v41 }
 0x106   :  { %v199_v45 = vpop.eup %198  ;;  %v67_v46 = vadd.f32 1e-05, %v64_v43 }
 0x107   :  { %v73_v47 = vmul.f32 %v197_v37, %v72_v44  ;;  %v79_v48 = vmul.f32 %v199_v45, %v66_v38  ;;  %vm85_vm5 = vweird.f32 %v199_v45 }
 0x108   :  { %200 = vrsqrt.f32 %v67_v46  ;;  %vm86_vm7 = vmor %vm84_vm6, %vm85_vm5  ;;  %vm94_vm9 = vweird.f32 %v67_v46 }
 0x109   :  { %v80_v49 = vmul.f32 %v199_v45, %v79_v48  ;;  %v77_v50 = vsel %vm76_vm4, %v197_v37, %v73_v47 }
 0x10a   :  { %v98_v54 = vmul.f32 %v77_v50, %v47_v17 }
 0x10b   :  { %v81_v51 = vmul.f32 0.5, %v80_v49 }
 0x10c   :  { %v105_v61 = vmul.f32 %v191_v55, %v98_v54 }
 0x10d   :  { %v82_v52 = vsub.f32 1.5, %v81_v51 }
 0x10e   :  { %v201_v53 = vpop.eup %200  ;;  %v112_v2 = vadd.f32 %v192_v62, %v105_v61 }
 0x10f   :  { %v83_v56 = vmul.f32 %v199_v45, %v82_v52  ;;  %v89_v57 = vmul.f32 %v201_v53, %v67_v46  ;;  %vm95_vm8 = vweird.f32 %v201_v53 }
 0x110   :  { %vm96_vm10 = vmor %vm94_vm9, %vm95_vm8 }
 0x111   :  { %v87_v58 = vsel %vm86_vm7, %v199_v45, %v83_v56  ;;  %v90_v59 = vmul.f32 %v201_v53, %v89_v57 }
 0x112   :  { %v99_v60 = vmul.f32 %v87_v58, %v48_v24 }
 0x113   :  { %v91_v63 = vmul.f32 0.5, %v90_v59 }
 0x114   :  { %v106_v0 = vmul.f32 %v191_v55, %v99_v60 }
 0x115   :  { %v92_v1 = vsub.f32 1.5, %v91_v63 }
 0x116   :  { %v113_v3 = vadd.f32 %v192_v62, %v106_v0 }
 0x117   :  { %v93_v4 = vmul.f32 %v201_v53, %v92_v1 }
 0x118   :  { %v115_v5 = vpack.c.bf16 %v113_v3, %v112_v2 }
 0x119   :  { %v97_v6 = vsel %vm96_vm10, %v201_v53, %v93_v4 }
 0x11a   :  { %180 = vmatmul.msk.bf16.vlgmr.msra.gmra.mxu0 %vm27_vm0, %v115_v5  ;;  %v100_v7 = vmul.f32 %v97_v6, %v243_v25 }
 0x11c   :  { %v107_v8 = vmul.f32 %v191_v55, %v100_v7 }
 0x11e   :  { %v114_v9 = vadd.f32 %v192_v62, %v107_v8 }
 0x120   :  { %v116_v10 = vpack.c.bf16 %v114_v9, %v114_v9 }
 0x122   :  { %181 = vmatmul.msk.bf16.vlgmr.msra.gmra.mxu1 %vm27_vm0, %v116_v10 }
 0x197   :  { %v152_v12 = vpop.f32.mrf.mxu0 }
 0x198   :  { %v153_v13 = vadd.f32 %v193_v11, %v152_v12 }
 0x19a   :  { %v161_v14 = vpack.c.bf16 %v153_v13, %v153_v13 }
 0x19c   :  { %165 = vst.msk [vmem:[%s281_s5] sm:$0xf] %vm164_vm11, %v161_v14 }
 0x19f   :  { %v154_v15 = vpop.f32.mrf.mxu0  ;;  %v157_v16 = vpop.f32.mrf.mxu1 }
 0x1a0   :  { %v155_v17 = vadd.f32 %v193_v11, %v154_v15  ;;  %v158_v18 = vadd.f32 %v193_v11, %v157_v16 }
 0x1a2   :  { %v162_v19 = vpack.c.bf16 %v155_v17, %v155_v17  ;;  %v163_v20 = vpack.c.bf16 %v158_v18, %v158_v18 }
 0x1a4   :  { %166 = vst.msk [vmem:[%s281_s5 + $0x4] sm:$0xf] %vm164_vm11, %v162_v19 }
 0x1a5   :  { %167 = vst.msk [vmem:[%s281_s5 + $0x8] sm:$0xf] %vm164_vm11, %v163_v20 }
 0x1a7   :  { %v159_v21 = vpop.f32.mrf.mxu1 }

// kernel: mapping_network_forward.10
= control target key start
LH: loop header
LB: loop body
LE: loop exit
PB: predicated region body
PF: predicated region fallthrough
CT: control target
= control target key end

     0   :  { %vm33_vm0 = vcmask 261120   ;;  %v304_v8 = vmov 32.0   ;;  %vm208_vm11 = vcmask 523264   ;;  %vm239_vm12 = vcmask 257024   ;;  %s418_s0 = inlined_call_operand.vmem [shape: bf16[24,32], index: 0, kind: input, shape index: {}]   ;;  %s419_s1 = inlined_call_operand.vmem [shape: f32[1,32], index: 1, kind: input, shape index: {}]   ;;  %s420_s2 = inlined_call_operand.vmem [shape: f32[1,32], index: 2, kind: input, shape index: {}]   ;;  %s421_s4 = inlined_call_operand.vmem [shape: f32[1,64], index: 4, kind: input, shape index: {}]   ;;  %s422_s3 = inlined_call_operand.vmem [shape: bf16[32,64], index: 3, kind: input, shape index: {}]   ;;  %s423_s6 = inlined_call_operand.vmem [shape: f32[1,32], index: 6, kind: input, shape index: {}]   ;;  %s424_s5 = inlined_call_operand.vmem [shape: bf16[64,32], index: 5, kind: input, shape index: {}]   ;;  %s425_s7 = inlined_call_operand.vmem [shape: bf16[24,32], index: 7, kind: output, shape index: {}]  }
   0x1   :  { %v282_v0 = vld [vmem:[%s418_s0] sm:$0xff]   ;;  %v29_v1 = vld [vmem:[%s418_s0 + $0x8] sm:$0xf]  ;;  %296 = vrcp.f32 %v304_v8 }
   0x2   :  { %v351_v2 = vunpack.c.l.bf16 %v282_v0  ;;  %v353_v3 = vunpack.c.l.bf16 %v29_v1  ;;  %v359_v6 = vunpack.c.h.bf16 %v282_v0  ;;  %v276_v30 = vld [vmem:[%s422_s3 + $0x8] sm:$0xff]  ;;  %v275_v33 = vld [vmem:[%s422_s3] sm:$0xff] }
   0x3   :  { %155 = vmatpush.bf16.msra.mxu0 %v276_v30  ;;  %285 = vmatpush.bf16.msra.mxu3 %v276_v30  ;;  %v292_v55 = vld [vmem:[%s419_s1] ss:$0 sm:$0xff] }
   0x4   :  { %v34_v4 = vsel %vm33_vm0, %v351_v2, 0.0  ;;  %v40_v5 = vsel %vm33_vm0, %v353_v3, 0.0  ;;  %v37_v7 = vsel %vm33_vm0, %v359_v6, 0.0  ;;  %v293_v62 = vld [vmem:[%s420_s2] ss:$0 sm:$0xff] }
   0x5   :  { %35 = vadd.xlane.f32.xlu0 %v34_v4  ;;  %41 = vadd.xlane.f32.xlu1 %v40_v5 }
   0x7   :  { %v297_v9 = vpop.eup %296  ;;  %156 = vmatpush.bf16.msra.mxu0 %v275_v33  ;;  %286 = vmatpush.bf16.msra.mxu3 %v275_v33 }
   0x8   :  { %v44_v10 = vmul.f32 32.0, %v297_v9  ;;  %vm48_vm1 = vweird.f32 %v297_v9 }
   0xa   :  { %v45_v11 = vsub.f32 1.0, %v44_v10 }
   0xc   :  { %v46_v12 = vmul.f32 %v297_v9, %v45_v11 }
   0xd   :  { %38 = vadd.xlane.f32.xlu0 %v37_v7 }
   0xe   :  { %v47_v13 = vadd.f32 %v297_v9, %v46_v12 }
  0x10   :  { %v49_v14 = vsel %vm48_vm1, %v297_v9, %v47_v13 }
  0x78   :  { %v36_v15 = vpop.xlane.xlu0 %35  ;;  %v42_v19 = vpop.xlane.xlu1 %41 }
  0x79   :  { %v50_v16 = vmul.f32 %v49_v14, %v36_v15  ;;  %v52_v23 = vmul.f32 %v49_v14, %v42_v19  ;;  %v279_v15 = vld [vmem:[%s424_s5 + $0x10] sm:$0xff]  ;;  %v294_v19 = vld [vmem:[%s421_s4] ss:$0 sm:$0xff] }
  0x7b   :  { %v53_v17 = vsub.f32 %v351_v2, %v50_v16  ;;  %v367_v25 = vsub.f32 %v353_v3, %v52_v23  ;;  %v278_v16 = vld [vmem:[%s424_s5 + $0x8] sm:$0xff] }
  0x7d   :  { %v56_v18 = vmul.f32 %v53_v17, %v53_v17  ;;  %v58_v28 = vmul.f32 %v367_v25, %v367_v25 }
  0x7f   :  { %v59_v20 = vsel %vm33_vm0, %v56_v18, 0.0  ;;  %v65_v29 = vsel %vm33_vm0, %v58_v28, 0.0 }
  0x80   :  { %60 = vadd.xlane.f32.xlu1 %v59_v20  ;;  %v39_v21 = vpop.xlane.xlu0 %38 }
  0x81   :  { %v51_v22 = vmul.f32 %v49_v14, %v39_v21 }
  0x83   :  { %v54_v24 = vsub.f32 %v359_v6, %v51_v22 }
  0x85   :  { %v57_v26 = vmul.f32 %v54_v24, %v54_v24 }
  0x87   :  { %v62_v27 = vsel %vm33_vm0, %v57_v26, 0.0 }
  0x88   :  { %63 = vadd.xlane.f32.xlu2 %v62_v27 }
  0x90   :  { %66 = vadd.xlane.f32.xlu2 %v65_v29 }
  0xf3   :  { %v61_v31 = vpop.xlane.xlu1 %60 }
  0xf4   :  { %v68_v32 = vmul.f32 %v61_v31, %v49_v14  ;;  %v295_v31 = vld [vmem:[%s423_s6] ss:$0 sm:$0xff] }
  0xf6   :  { %v71_v34 = vadd.f32 1e-05, %v68_v32 }
  0xf8   :  { %298 = vrsqrt.f32 %v71_v34  ;;  %vm80_vm3 = vweird.f32 %v71_v34 }
  0xfb   :  { %v64_v35 = vpop.xlane.xlu2 %63 }
  0xfc   :  { %v69_v36 = vmul.f32 %v64_v35, %v49_v14 }
  0xfe   :  { %v299_v37 = vpop.eup %298  ;;  %v72_v38 = vadd.f32 1e-05, %v69_v36 }
  0xff   :  { %v75_v39 = vmul.f32 %v299_v37, %v71_v34  ;;  %vm81_vm2 = vweird.f32 %v299_v37 }
 0x100   :  { %300 = vrsqrt.f32 %v72_v38  ;;  %vm82_vm4 = vmor %vm80_vm3, %vm81_vm2  ;;  %vm90_vm6 = vweird.f32 %v72_v38 }
 0x101   :  { %v76_v40 = vmul.f32 %v299_v37, %v75_v39 }
 0x103   :  { %v77_v41 = vmul.f32 0.5, %v76_v40  ;;  %v67_v42 = vpop.xlane.xlu2 %66 }
 0x104   :  { %v70_v43 = vmul.f32 %v67_v42, %v49_v14  ;;  %v280_v14 = vld [vmem:[%s424_s5 + $0x18] sm:$0xff] }
 0x105   :  { %v78_v44 = vsub.f32 1.5, %v77_v41  ;;  %219 = vmatpush.bf16.msra.mxu1 %v280_v14  ;;  %287 = vmatpush.bf16.msra.mxu2 %v280_v14 }
 0x106   :  { %v301_v45 = vpop.eup %300  ;;  %v73_v46 = vadd.f32 1e-05, %v70_v43 }
 0x107   :  { %v79_v47 = vmul.f32 %v299_v37, %v78_v44  ;;  %v85_v48 = vmul.f32 %v301_v45, %v72_v38  ;;  %vm91_vm5 = vweird.f32 %v301_v45 }
 0x108   :  { %302 = vrsqrt.f32 %v73_v46  ;;  %vm92_vm7 = vmor %vm90_vm6, %vm91_vm5  ;;  %vm100_vm9 = vweird.f32 %v73_v46 }
 0x109   :  { %v86_v49 = vmul.f32 %v301_v45, %v85_v48  ;;  %v83_v50 = vsel %vm82_vm4, %v299_v37, %v79_v47  ;;  %220 = vmatpush.bf16.msra.mxu1 %v279_v15  ;;  %288 = vmatpush.bf16.msra.mxu2 %v279_v15 }
 0x10a   :  { %v104_v54 = vmul.f32 %v83_v50, %v53_v17  ;;  %v277_v17 = vld [vmem:[%s424_s5] sm:$0xff] }
 0x10b   :  { %v87_v51 = vmul.f32 0.5, %v86_v49 }
 0x10c   :  { %v111_v61 = vmul.f32 %v292_v55, %v104_v54 }
 0x10d   :  { %v88_v52 = vsub.f32 1.5, %v87_v51  ;;  %221 = vmatpush.bf16.msra.mxu1 %v278_v16  ;;  %289 = vmatpush.bf16.msra.mxu2 %v278_v16 }
 0x10e   :  { %v303_v53 = vpop.eup %302  ;;  %v118_v4 = vadd.f32 %v293_v62, %v111_v61 }
 0x10f   :  { %v89_v56 = vmul.f32 %v301_v45, %v88_v52  ;;  %v95_v57 = vmul.f32 %v303_v53, %v73_v46  ;;  %vm101_vm8 = vweird.f32 %v303_v53 }
 0x110   :  { %vm102_vm10 = vmor %vm100_vm9, %vm101_vm8 }
 0x111   :  { %v93_v58 = vsel %vm92_vm7, %v301_v45, %v89_v56  ;;  %v96_v59 = vmul.f32 %v303_v53, %v95_v57  ;;  %222 = vmatpush.bf16.msra.mxu1 %v277_v17  ;;  %290 = vmatpush.bf16.msra.mxu2 %v277_v17 }
 0x112   :  { %v105_v60 = vmul.f32 %v93_v58, %v54_v24 }
 0x113   :  { %v97_v63 = vmul.f32 0.5, %v96_v59 }
 0x114   :  { %v112_v0 = vmul.f32 %v292_v55, %v105_v60 }
 0x115   :  { %v98_v1 = vsub.f32 1.5, %v97_v63 }
 0x116   :  { %v119_v5 = vadd.f32 %v293_v62, %v112_v0 }
 0x117   :  { %v99_v7 = vmul.f32 %v303_v53, %v98_v1 }
 0x118   :  { %v121_v8 = vpack.c.bf16 %v119_v5, %v118_v4 }
 0x119   :  { %v103_v9 = vsel %vm102_vm10, %v303_v53, %v99_v7 }
 0x11a   :  { %255 = vmatmul.msk.bf16.vlgmr.msra.gmra.mxu0 %vm33_vm0, %v121_v8  ;;  %v106_v10 = vmul.f32 %v103_v9, %v367_v25 }
 0x11c   :  { %v113_v11 = vmul.f32 %v292_v55, %v106_v10 }
 0x11e   :  { %v120_v12 = vadd.f32 %v293_v62, %v113_v11 }
 0x120   :  { %v122_v13 = vpack.c.bf16 %v120_v12, %v120_v12 }
 0x122   :  { %256 = vmatmul.msk.bf16.vlgmr.msra.gmra.mxu3 %vm33_vm0, %v122_v13 }
 0x197   :  { %v158_v18 = vpop.f32.mrf.mxu0 }
 0x198   :  { %v159_v20 = vadd.f32 %v294_v19, %v158_v18 }
 0x19a   :  { %v167_v23 = vmax.f32 %v159_v20, 0.0 }
 0x19f   :  { %v160_v21 = vpop.f32.mrf.mxu0 }
 0x1a0   :  { %v161_v22 = vadd.f32 %v294_v19, %v160_v21 }
 0x1a2   :  { %v168_v24 = vmax.f32 %v161_v22, 0.0 }
 0x1a4   :  { %v170_v25 = vpack.c.bf16 %v168_v24, %v167_v23 }
 0x1a5   :  { %v163_v26 = vpop.f32.mrf.mxu3 }
 0x1a6   :  { %v164_v27 = vadd.f32 %v294_v19, %v163_v26  ;;  %273 = vmatmul.msk.bf16.vlgmr.msra.gmra.mxu1 %vm208_vm11, %v170_v25 }
 0x1a8   :  { %v169_v28 = vmax.f32 %v164_v27, 0.0 }
 0x1aa   :  { %v171_v29 = vpack.c.bf16 %v169_v28, %v169_v28 }
 0x1ac   :  { %274 = vmatmul.msk.bf16.vlgmr.msra.gmra.mxu2 %vm208_vm11, %v171_v29 }
 0x1ad   :  { %v165_v30 = vpop.f32.mrf.mxu3 }
 0x223   :  { %v224_v32 = vpop.f32.mrf.mxu1 }
 0x224   :  { %v225_v33 = vadd.f32 %v295_v31, %v224_v32 }
 0x226   :  { %v233_v34 = vadd.f32 %v351_v2, %v225_v33 }
 0x228   :  { %v236_v35 = vpack.c.bf16 %v233_v34, %v233_v34 }
 0x22a   :  { %240 = vst.msk [vmem:[%s425_s7] sm:$0xf] %vm239_vm12, %v236_v35 }
 0x22b   :  { %v226_v36 = vpop.f32.mrf.mxu1 }
 0x22c   :  { %v227_v37 = vadd.f32 %v295_v31, %v226_v36 }
 0x22e   :  { %v234_v38 = vadd.f32 %v359_v6, %v227_v37 }
 0x22f   :  { %v229_v39 = vpop.f32.mrf.mxu2 }
 0x230   :  { %v237_v40 = vpack.c.bf16 %v234_v38, %v234_v38  ;;  %v230_v41 = vadd.f32 %v295_v31, %v229_v39 }
 0x232   :  { %241 = vst.msk [vmem:[%s425_s7 + $0x4] sm:$0xf] %vm239_vm12, %v237_v40  ;;  %v235_v42 = vadd.f32 %v230_v41, %v353_v3 }
 0x234   :  { %v238_v2 = vpack.c.bf16 %v235_v42, %v235_v42 }
 0x236   :  { %242 = vst.msk [vmem:[%s425_s7 + $0x8] sm:$0xf] %vm239_vm12, %v238_v2 }
 0x237   :  { %v231_v43 = vpop.f32.mrf.mxu2 }

// kernel: mapping_network_forward.9
= control target key start
LH: loop header
LB: loop body
LE: loop exit
PB: predicated region body
PF: predicated region fallthrough
CT: control target
= control target key end

     0   :  { %s1606_s15 = smov 0   ;;  %s1878_s0 = inlined_call_operand.vmem [shape: bf16[2,12,96], index: 0, kind: input, shape index: {}]   ;;  %s1879_s1 = inlined_call_operand.vmem [shape: bf16[2,12,32], index: 1, kind: input, shape index: {}]   ;;  %s1880_s2 = inlined_call_operand.vmem [shape: bf16[32,32], index: 2, kind: input, shape index: {}]   ;;  %s1881_s3 = inlined_call_operand.vmem [shape: f32[1,32], index: 3, kind: input, shape index: {}]   ;;  %s1882_s4 = inlined_call_operand.vmem [shape: bf16[2,12,32], index: 4, kind: output, shape index: {}]  }
   0x1 LB: > { %s1210_s16 = sadd.s32 4294967295, %s1549_s15   ;;  %p1214_p0 = scmp.ge.s32.totalorder %s1549_s15, 1  ;;  %s1549_s15 = sphi %s1606_s15, %s14_s15  }
   0x2   : > { %p172_p1 = scmp.lt.s32.totalorder %s1549_s15, 3 }
   0x4   : > { %p173_p2 = pnand %p1214_p0, %p172_p1 }
   0x5   : > { %p203_p3 = scmp.lt.s32.totalorder (!%p173_p2), %s1210_s16, 1  ;;  %s1551_s21 = smov (!%p173_p2), 96  }
   0x6   : > { %176 = sbr.rel (%p173_p2) target bundleno = 1509 (0x5e5), region = 36  ;;  %s1552_s22 = smov (!%p173_p2), 64  }
   0x7   : > { %s1553_s23 = smov (!%p173_p2), 88   ;;  %s1554_s24 = smov (!%p173_p2), 84  }
   0x8   : > { %s1555_s25 = smov (!%p173_p2), 116   ;;  %s1556_s26 = smov (!%p173_p2), 124  }
   0x9   : > { %s1557_s27 = smov (!%p173_p2), 92   ;;  %s1558_s28 = smov (!%p173_p2), 120  }
   0xa   : > { %s1559_s29 = smov (!%p173_p2), 76   ;;  %s1560_s30 = smov (!%p173_p2), 80  }
   0xb   : > { %s1884_s16 = smov (!%p203_p3, %s1210_s16), 1  ;;  %vm229_vm0 = vcmask 31744   ;;  %vm263_vm1 = vcmask 97280   ;;  %s1561_s5 = smov 112   ;;  %vm298_vm2 = vcmask 1043456   ;;  %vm267_vm3 = vcmask 93184  }
   0xc   : > { %s1614_s17 = sshll.u32 %s1884_s16, 3  ;;  %s1562_s6 = smov 68   ;;  %vm1075_vm4 = vcmask 64512   ;;  %vm1080_vm5 = vcmask 130048   ;;  %vm1083_vm6 = vcmask 162816   ;;  %vm1086_vm7 = vcmask 195584  }
   0xd   : > { %s207_s20 = scalar_lea.vmem %s1878_s0, %s1614_s17  ;;  %s1563_s7 = smov 100   ;;  %vm1089_vm8 = vcmask 228352   ;;  %vm1113_vm9 = vcmask 261120   ;;  %vm1139_vm10 = vcmask 257024   ;;  %vm1141_vm11 = vcmask 254976  }
   0xe   : > { %v220_v0 = vld [vmem:[%s207_s20 + $0x4] sm:$0x3]  ;;  %v219_v2 = vld [vmem:[%s207_s20] sm:$0xf]  ;;  %s1564_s8 = smov 72   ;;  %s1565_s9 = smov 104  }
   0xf   : > { %v222_v1 = vunpack.c.l.bf16 %v220_v0  ;;  %v221_v3 = vunpack.c.l.bf16 %v219_v2  ;;  %s1566_s10 = smov 108   ;;  %s1567_s11 = smov 60  }
  0x10   : > { %s1568_s12 = smov 56   ;;  %s1569_s13 = smov 48  }
  0x11   : > { %227 = vrot.lane.b32.xlu0 %v222_v1, %s1551_s21  ;;  %v1620_v4 = vpack.i.bf16 %v221_v3, %v222_v1  ;;  %v1626_v6 = vpack.i.bf16 %v222_v1, %v221_v3  ;;  %s1570_s14 = smov 52   ;;  %s1571_s16 = smov 44  }
  0x12   : > { %s1572_s18 = smov 40   ;;  %s1573_s19 = smov 36  }
  0x13   : > { %1339 = vrot.lane.b32.xlu2 %v1626_v6, %s1556_s26  ;;  %s1574_s20 = smov 4   ;;  %s1580_s26 = smov 28  }
  0x19   : > { %225 = vrot.lane.b32.xlu0 %v221_v3, %s1551_s21  ;;  %s1575_s21 = smov 12  }
  0x21   : > { %1344 = vrot.lane.b32.xlu0 %v1620_v4, %s1552_s22  ;;  %s1576_s22 = smov 20  }
  0x29   : > { %1349 = vrot.lane.b32.xlu0 %v1620_v4, %s1553_s23  ;;  %s1577_s23 = smov 8  }
  0x31   : > { %1354 = vrot.lane.b32.xlu0 %v1620_v4, %s1554_s24  ;;  %s1578_s24 = smov 16  }
  0x39   : > { %1364 = vrot.lane.b32.xlu0 %v1626_v6, %s1555_s25  ;;  %s1579_s25 = smov 24  }
  0x41   : > { %1374 = vrot.lane.b32.xlu0 %v1620_v4, %s1559_s29 }
  0x49   : > { %1389 = vrot.lane.b32.xlu0 %v1620_v4, %s1564_s8 }
  0x51   : > { %1399 = vrot.lane.b32.xlu0 %v1626_v6, %s1565_s9 }
  0x6d   : > { %v1340_v31 = vpop.permute.xlu2 %1339 }
  0x6e   : > { %v1341_v32 = vunpack.i.l.bf16 %v1340_v31  ;;  %v1342_v33 = vunpack.i.h.bf16 %v1340_v31 }
  0x83   : > { %v228_v5 = vpop.permute.xlu0 %227 }
  0x84   : > { %1221 = vmatpush.xpose.msk.msra.mxu0 %vm229_vm0, %v228_v5 }
  0x8b   : > { %v226_v7 = vpop.permute.xlu0 %225 }
  0x8c   : > { %1222 = vmatpush.xpose.msk.msra.mxu0 %vm229_vm0, %v226_v7 }
  0x8f   : > { %1223 = vmatmul.msk.f32.vlgmr.msra.gmra.mxu0 %vm229_vm0, %v221_v3 }
  0x93   : > { %v1345_v8 = vpop.permute.xlu0 %1344 }
  0x94   : > { %v1346_v23 = vunpack.i.l.bf16 %v1345_v8  ;;  %v1347_v24 = vunpack.i.h.bf16 %v1345_v8 }
  0x96   : > { %1225 = vmatpush.msk.msra.mxu1 %vm298_vm2, %v1346_v23  ;;  %1293 = vmatpush.msk.msra.mxu3 %vm298_vm2, %v1346_v23 }
  0x97   : > { %1224 = vmatmul.msk.f32.gmra.mxu0 %vm229_vm0, %v222_v1 }
  0x98   : > { %316 = vmatpush.msra.mxu1 %v1347_v24  ;;  %1294 = vmatpush.msra.mxu3 %v1347_v24 }
  0x9b   : > { %v1350_v12 = vpop.permute.xlu0 %1349 }
  0x9c   : > { %v1351_v25 = vunpack.i.l.bf16 %v1350_v12  ;;  %v1352_v27 = vunpack.i.h.bf16 %v1350_v12 }
  0x9e   : > { %1235 = vmatpush.xpose.msk.msrb.mxu1 %vm229_vm0, %v1351_v25 }
  0xa2   : > { %1236 = vmatpush.xpose.msk.msrb.mxu1 %vm229_vm0, %v1352_v27 }
  0xa3   : > { %v1355_v13 = vpop.permute.xlu0 %1354 }
  0xa4   : > { %v1356_v14 = vunpack.i.l.bf16 %v1355_v13  ;;  %v1357_v15 = vunpack.i.h.bf16 %v1355_v13 }
  0xa6   : > { %1242 = vmatpush.xpose.msk.msrb.mxu0 %vm229_vm0, %v1356_v14 }
  0xaa   : > { %1243 = vmatpush.xpose.msk.msrb.mxu0 %vm229_vm0, %v1357_v15 }
  0xab   : > { %v1365_v16 = vpop.permute.xlu0 %1364 }
  0xac   : > { %v1366_v17 = vunpack.i.l.bf16 %v1365_v16  ;;  %v1367_v18 = vunpack.i.h.bf16 %v1365_v16 }
  0xae   : > { %1244 = vmatmul.msk.f32.vlgmr.msrb.gmra.mxu0 %vm229_vm0, %v1366_v17 }
  0xb3   : > { %v1375_v42 = vpop.permute.xlu0 %1374 }
  0xb4   : > { %v1376_v43 = vunpack.i.l.bf16 %v1375_v42  ;;  %v1377_v44 = vunpack.i.h.bf16 %v1375_v42 }
  0xb6   : > { %1245 = vmatmul.msk.f32.gmra.mxu0 %vm229_vm0, %v1367_v18 }
  0xb7   : > { %1256 = vmatpush.xpose.msk.msra.mxu0 %vm229_vm0, %v1376_v43 }
  0xbb   : > { %1257 = vmatpush.xpose.msk.msra.mxu0 %vm229_vm0, %v1377_v44  ;;  %v1390_v62 = vpop.permute.xlu0 %1389 }
  0xbc   : > { %v1391_v63 = vunpack.i.l.bf16 %v1390_v62  ;;  %v1392_v0 = vunpack.i.h.bf16 %v1390_v62 }
 0x10c   : > { %v255_v9 = vpop.f32.mrf.mxu0 }
 0x10d   : > { %v261_v10 = vmul.f32 0.5, %v255_v9  ;;  %v1400_v9 = vpop.permute.xlu0 %1399 }
 0x10e   : > { %v1402_v15 = vunpack.i.h.bf16 %v1400_v9 }
 0x10f   : > { %v264_v11 = vsel %vm263_vm1, %v261_v10, -inf }
 0x110   : > { %265 = vmax.xlane.f32.xlu1 %v264_v11  ;;  %v1401_v11 = vunpack.i.l.bf16 %v1400_v9 }
 0x114   : > { %v258_v34 = vpop.f32.mrf.mxu0 }
 0x115   : > { %v1659_v36 = vmul.f32 0.5, %v258_v34 }
 0x117   : > { %v268_v37 = vsel %vm267_vm3, %v1659_v36, -inf }
 0x118   : > { %269 = vmax.xlane.f32.xlu0 %v268_v37 }
 0x129   : > { %1334 = vrot.lane.b32.xlu1 %v1620_v4, %s1557_s27 }
 0x12b   : > { %v1657_v35 = vpop.f32.mrf.mxu0 }
 0x12c   : > { %v561_v13 = vmul.f32 0.5, %v1657_v35 }
 0x12e   : > { %v563_v14 = vsel %vm263_vm1, %v561_v13, -inf }
 0x131   : > { %1359 = vrot.lane.b32.xlu1 %v1626_v6, %s1558_s28 }
 0x133   : > { %v558_v38 = vpop.f32.mrf.mxu0 }
 0x134   : > { %v1663_v39 = vmul.f32 0.5, %v558_v38 }
 0x136   : > { %v566_v40 = vsel %vm267_vm3, %v1663_v39, -inf }
 0x137   : > { %567 = vmax.xlane.f32.xlu0 %v566_v40 }
 0x139   : > { %1369 = vrot.lane.b32.xlu1 %v1620_v4, %s1560_s30 }
 0x141   : > { %1379 = vrot.lane.b32.xlu1 %v1626_v6, %s1561_s5 }
 0x149   : > { %1394 = vrot.lane.b32.xlu1 %v1620_v4, %s1562_s6 }
 0x151   : > { %1404 = vrot.lane.b32.xlu1 %v1626_v6, %s1563_s7  ;;  %s212_s7 = scalar_lea.vmem %s1879_s1, %s1614_s17 }
 0x183   : > { %v266_v19 = vpop.xlane.xlu1 %265 }
 0x184   : > { %v271_v20 = vsub.f32 %v261_v10, %v266_v19 }
 0x186   : > { %v273_v21 = vmul.f32 1.442695, %v271_v20 }
 0x188   : > { %1479 = vpow2.f32 %v273_v21 }
 0x18b   : > { %v270_v31 = vpop.xlane.xlu0 %269 }
 0x18e   : > { %v1480_v22 = vpop.eup %1479 }
 0x18f   : > { %v277_v26 = vsel %vm263_vm1, %v1480_v22, 0.0 }
 0x190   : > { %278 = vadd.xlane.f32.xlu2 %v277_v26 }
 0x19b   : > { %v1335_v28 = vpop.permute.xlu1 %1334 }
 0x19c   : > { %v1336_v29 = vunpack.i.l.bf16 %v1335_v28  ;;  %v1337_v30 = vunpack.i.h.bf16 %v1335_v28 }
 0x19e   : > { %1228 = vmatpush.xpose.msk.msra.mxu2 %vm229_vm0, %v1336_v29 }
 0x1a2   : > { %1229 = vmatpush.xpose.msk.msra.mxu2 %vm229_vm0, %v1337_v30 }
 0x1a3   : > { %v1360_v41 = vpop.permute.xlu1 %1359 }
 0x1a4   : > { %v1361_v57 = vunpack.i.l.bf16 %v1360_v41  ;;  %v1362_v60 = vunpack.i.h.bf16 %v1360_v41 }
 0x1a5   : > { %1230 = vmatmul.msk.f32.vlgmr.msra.gmra.mxu2 %vm229_vm0, %v1341_v32 }
 0x1a8   : > { %1384 = vrot.lane.b32.xlu2 %v1626_v6, %s1566_s10 }
 0x1aa   : > { %v568_v40 = vpop.xlane.xlu0 %567 }
 0x1ab   : > { %v1370_v45 = vpop.permute.xlu1 %1369  ;;  %v570_v42 = vsub.f32 %v1663_v39, %v568_v40 }
 0x1ac   : > { %v1371_v52 = vunpack.i.l.bf16 %v1370_v45  ;;  %v1372_v56 = vunpack.i.h.bf16 %v1370_v45 }
 0x1ad   : > { %1231 = vmatmul.msk.f32.gmra.mxu2 %vm229_vm0, %v1342_v33 }
 0x1b3   : > { %v1380_v46 = vpop.permute.xlu1 %1379 }
 0x1b4   : > { %v1381_v1 = vunpack.i.l.bf16 %v1380_v46  ;;  %v1382_v5 = vunpack.i.h.bf16 %v1380_v46 }
 0x1bb   : > { %v1395_v47 = vpop.permute.xlu1 %1394 }
 0x1bc   : > { %v1396_v48 = vunpack.i.l.bf16 %v1395_v47  ;;  %v1397_v49 = vunpack.i.h.bf16 %v1395_v47  ;;  %v573_v47 = vmul.f32 1.442695, %v570_v42 }
 0x1be   : > { %1270 = vmatpush.xpose.msk.msrb.mxu0 %vm229_vm0, %v1396_v48 }
 0x1c2   : > { %1271 = vmatpush.xpose.msk.msrb.mxu0 %vm229_vm0, %v1397_v49 }
 0x1c3   : > { %v1405_v59 = vpop.permute.xlu1 %1404 }
 0x1c4   : > { %v1406_v61 = vunpack.i.l.bf16 %v1405_v59  ;;  %v1407_v2 = vunpack.i.h.bf16 %v1405_v59 }
 0x203   : > { %v279_v50 = vpop.xlane.xlu2 %278 }
 0x204   : > { %1481 = vrcp.f32 %v279_v50 }
 0x20a   : > { %v1482_v51 = vpop.eup %1481 }
 0x20b   : > { %v1385_v53 = vpop.permute.xlu2 %1384  ;;  %v285_v54 = vmul.f32 %v1482_v51, %v1480_v22  ;;  %v272_v51 = vsub.f32 %v1659_v36, %v270_v31 }
 0x20c   : > { %v1386_v55 = vunpack.i.l.bf16 %v1385_v53  ;;  %v1387_v58 = vunpack.i.h.bf16 %v1385_v53 }
 0x20d   : > { %1226 = vmatmul.msk.f32.vlgmr.msra.gmra.mxu1 %vm263_vm1, %v285_v54  ;;  %v275_v53 = vmul.f32 1.442695, %v272_v51 }
 0x20e   : > { %1258 = vmatmul.msk.f32.vlgmr.msra.gmra.mxu0 %vm229_vm0, %v1386_v55  ;;  %1249 = vmatpush.xpose.msk.msra.mxu1 %vm229_vm0, %v1371_v52 }
 0x212   : > { %1250 = vmatpush.xpose.msk.msra.mxu1 %vm229_vm0, %v1372_v56 }
 0x215   : > { %1237 = vmatmul.msk.f32.vlgmr.msrb.gmra.mxu1 %vm229_vm0, %v1361_v57 }
 0x216   : > { %1259 = vmatmul.msk.f32.gmra.mxu0 %vm229_vm0, %v1387_v58  ;;  %1263 = vmatpush.xpose.msk.msrb.mxu1 %vm229_vm0, %v1391_v63 }
 0x21a   : > { %1264 = vmatpush.xpose.msk.msrb.mxu1 %vm229_vm0, %v1392_v0 }
 0x21d   : > { %1238 = vmatmul.msk.f32.gmra.mxu1 %vm229_vm0, %v1362_v60 }
 0x21e   : > { %1272 = vmatmul.msk.f32.vlgmr.msrb.gmra.mxu0 %vm229_vm0, %v1406_v61 }
 0x225   : > { %1251 = vmatmul.msk.f32.vlgmr.msra.gmra.mxu1 %vm229_vm0, %v1381_v1 }
 0x226   : > { %1273 = vmatmul.msk.f32.gmra.mxu0 %vm229_vm0, %v1407_v2 }
 0x228   : > { %v357_v3 = vpop.f32.mrf.mxu2 }
 0x229   : > { %v363_v6 = vmul.f32 0.5, %v357_v3 }
 0x22b   : > { %v365_v7 = vsel %vm263_vm1, %v363_v6, -inf }
 0x22c   : > { %366 = vmax.xlane.f32.xlu1 %v365_v7 }
 0x22d   : > { %1252 = vmatmul.msk.f32.gmra.mxu1 %vm229_vm0, %v1382_v5 }
 0x230   : > { %v360_v8 = vpop.f32.mrf.mxu2 }
 0x231   : > { %v364_v10 = vmul.f32 0.5, %v360_v8 }
 0x233   : > { %v368_v12 = vsel %vm267_vm3, %v364_v10, -inf }
 0x234   : > { %369 = vmax.xlane.f32.xlu2 %v368_v12 }
 0x235   : > { %1265 = vmatmul.msk.f32.vlgmr.msrb.gmra.mxu1 %vm229_vm0, %v1401_v11 }
 0x23c   : > { %564 = vmax.xlane.f32.xlu2 %v563_v14 }
 0x23d   : > { %1266 = vmatmul.msk.f32.gmra.mxu1 %vm229_vm0, %v1402_v15 }
 0x28a   : > { %v1711_v38 = vpop.f32.mrf.mxu1 }
 0x28b   : > { %v753_v16 = vpop.f32.mrf.mxu0 }
 0x28c   : > { %v1690_v17 = vmul.f32 0.5, %v753_v16 }
 0x28e   : > { %v761_v18 = vsel %vm263_vm1, %v1690_v17, -inf }
 0x28f   : > { %762 = vmax.xlane.f32.xlu1 %v761_v18 }
 0x292   : > { %v456_v44 = vpop.f32.mrf.mxu1 }
 0x293   : > { %v756_v19 = vpop.f32.mrf.mxu0  ;;  %v1718_v46 = vmul.f32 0.5, %v456_v44 }
 0x294   : > { %v1694_v20 = vmul.f32 0.5, %v756_v19 }
 0x295   : > { %v464_v49 = vsel %vm263_vm1, %v1718_v46, -inf }
 0x296   : > { %v764_v21 = vsel %vm267_vm3, %v1694_v20, -inf }
 0x297   : > { %765 = vmax.xlane.f32.xlu2 %v764_v21 }
 0x29a   : > { %v459_v58 = vpop.f32.mrf.mxu1 }
 0x29b   : > { %v951_v22 = vpop.f32.mrf.mxu0  ;;  %v1737_v36 = vmul.f32 0.5, %v459_v58 }
 0x29c   : > { %v1698_v23 = vmul.f32 0.5, %v951_v22 }
 0x29d   : > { %v467_v59 = vsel %vm267_vm3, %v1737_v36, -inf }
 0x29e   : > { %v959_v24 = vsel %vm263_vm1, %v1698_v23, -inf }
 0x29f   : > { %960 = vmax.xlane.f32.xlu2 %v959_v24  ;;  %v367_v45 = vpop.xlane.xlu1 %366 }
 0x2a0   : > { %v371_v48 = vsub.f32 %v363_v6, %v367_v45 }
 0x2a2   : > { %v373_v50 = vmul.f32 1.442695, %v371_v48  ;;  %v654_v60 = vpop.f32.mrf.mxu1 }
 0x2a3   : > { %v954_v25 = vpop.f32.mrf.mxu0  ;;  %v1741_v61 = vmul.f32 0.5, %v654_v60 }
 0x2a4   : > { %v1702_v26 = vmul.f32 0.5, %v954_v25 }
 0x2a5   : > { %v662_v62 = vsel %vm263_vm1, %v1741_v61, -inf }
 0x2a6   : > { %v962_v27 = vsel %vm267_vm3, %v1702_v26, -inf }
 0x2a7   : > { %v370_v28 = vpop.xlane.xlu2 %369  ;;  %963 = vmax.xlane.f32.xlu2 %v962_v27 }
 0x2a8   : > { %v372_v29 = vsub.f32 %v364_v10, %v370_v28  ;;  %1409 = vrot.lane.b32.xlu1 %v1620_v4, %s1567_s11 }
 0x2aa   : > { %v375_v30 = vmul.f32 1.442695, %v372_v29  ;;  %v657_v2 = vpop.f32.mrf.mxu1 }
 0x2ab   : > { %v1751_v6 = vmul.f32 0.5, %v657_v2 }
 0x2ac   : > { %1483 = vpow2.f32 %v375_v30 }
 0x2ad   : > { %v665_v8 = vsel %vm267_vm3, %v1751_v6, -inf }
 0x2af   : > { %v565_v32 = vpop.xlane.xlu2 %564 }
 0x2b0   : > { %v569_v33 = vsub.f32 %v561_v13, %v565_v32 }
 0x2b2   : > { %v1707_v34 = vpop.eup %1483  ;;  %v571_v35 = vmul.f32 1.442695, %v569_v33  ;;  %v852_v7 = vpop.f32.mrf.mxu1 }
 0x2b3   : > { %v380_v37 = vsel %vm267_vm3, %v1707_v34, 0.0  ;;  %v1755_v9 = vmul.f32 0.5, %v852_v7 }
 0x2b4   : > { %1485 = vpow2.f32 %v571_v35  ;;  %381 = vadd.xlane.f32.xlu0 %v380_v37 }
 0x2b5   : > { %1487 = vpow2.f32 %v573_v47  ;;  %v860_v11 = vsel %vm263_vm1, %v1755_v9, -inf }
 0x2b6   : > { %1489 = vpow2.f32 %v373_v50 }
 0x2b7   : > { %1491 = vpow2.f32 %v275_v53 }
 0x2ba   : > { %v1713_v41 = vpop.eup %1485  ;;  %v855_v14 = vpop.f32.mrf.mxu1 }
 0x2bb   : > { %v575_v43 = vsel %vm263_vm1, %v1713_v41, 0.0  ;;  %v1724_v39 = vpop.eup %1487  ;;  %v1761_v16 = vmul.f32 0.5, %v855_v14 }
 0x2bc   : > { %576 = vadd.xlane.f32.xlu0 %v575_v43  ;;  %v578_v52 = vsel %vm267_vm3, %v1724_v39, 0.0  ;;  %v1729_v54 = vpop.eup %1489 }
 0x2bd   : > { %v377_v55 = vsel %vm263_vm1, %v1729_v54, 0.0  ;;  %v1733_v56 = vpop.eup %1491  ;;  %v863_v18 = vsel %vm267_vm3, %v1761_v16, -inf }
 0x2be   : > { %v280_v57 = vsel %vm267_vm3, %v1733_v56, 0.0 }
 0x2bf   : > { %1414 = vrot.lane.b32.xlu2 %v1620_v4, %s1568_s12  ;;  %s217_s12 = scalar_lea.vmem %s1882_s4, %s1614_s17 }
 0x2c4   : > { %465 = vmax.xlane.f32.xlu0 %v464_v49 }
 0x2c7   : > { %1424 = vrot.lane.b32.xlu2 %v1620_v4, %s1569_s13 }
 0x2cc   : > { %579 = vadd.xlane.f32.xlu0 %v578_v52 }
 0x2d2   : > { %378 = vadd.xlane.f32.xlu1 %v377_v55 }
 0x2da   : > { %281 = vadd.xlane.f32.xlu1 %v280_v57 }
 0x2e2   : > { %468 = vmax.xlane.f32.xlu1 %v467_v59 }
 0x2f0   : > { %663 = vmax.xlane.f32.xlu2 %v662_v62 }
 0x2fb   : > { %1419 = vrot.lane.b32.xlu1 %v1620_v4, %s1570_s14 }
 0x302   : > { %v763_v63 = vpop.xlane.xlu1 %762 }
 0x303   : > { %v767_v0 = vsub.f32 %v1690_v17, %v763_v63 }
 0x305   : > { %v769_v1 = vmul.f32 1.442695, %v767_v0 }
 0x307   : > { %1493 = vpow2.f32 %v769_v1 }
 0x30a   : > { %v766_v10 = vpop.xlane.xlu2 %765 }
 0x30b   : > { %v768_v13 = vsub.f32 %v1694_v20, %v766_v10 }
 0x30d   : > { %v1747_v3 = vpop.eup %1493  ;;  %v771_v17 = vmul.f32 1.442695, %v768_v13 }
 0x30e   : > { %v773_v5 = vsel %vm263_vm1, %v1747_v3, 0.0 }
 0x30f   : > { %774 = vadd.xlane.f32.xlu0 %v773_v5  ;;  %1495 = vpow2.f32 %v771_v17 }
 0x312   : > { %v1770_v29 = vpop.xlane.xlu2 %960 }
 0x315   : > { %v1765_v22 = vpop.eup %1495 }
 0x316   : > { %v776_v20 = vsel %vm267_vm3, %v1765_v22, 0.0 }
 0x317   : > { %666 = vmax.xlane.f32.xlu0 %v665_v8 }
 0x31a   : > { %v1410_v12 = vpop.permute.xlu1 %1409  ;;  %v1776_v33 = vpop.xlane.xlu2 %963 }
 0x31b   : > { %v1411_v15 = vunpack.i.l.bf16 %v1410_v12  ;;  %v1412_v19 = vunpack.i.h.bf16 %v1410_v12 }
 0x31d   : > { %1232 = vmatpush.msk.msrb.mxu3 %vm298_vm2, %v1411_v15 }
 0x31f   : > { %861 = vmax.xlane.f32.xlu0 %v860_v11  ;;  %415 = vmatpush.msrb.mxu3 %v1412_v19  ;;  %v965_v11 = vsub.f32 %v1698_v23, %v1770_v29 }
 0x321   : > { %v967_v13 = vmul.f32 1.442695, %v965_v11 }
 0x322   : > { %v1415_v37 = vpop.permute.xlu2 %1414 }
 0x323   : > { %v1416_v42 = vunpack.i.l.bf16 %v1415_v37  ;;  %v1417_v45 = vunpack.i.h.bf16 %v1415_v37 }
 0x327   : > { %v382_v21 = vpop.xlane.xlu0 %381  ;;  %864 = vmax.xlane.f32.xlu0 %v863_v18 }
 0x32a   : > { %v1425_v48 = vpop.permute.xlu2 %1424 }
 0x32b   : > { %v1426_v50 = vunpack.i.l.bf16 %v1425_v48  ;;  %v1427_v52 = vunpack.i.h.bf16 %v1425_v48 }
 0x32f   : > { %v577_v24 = vpop.xlane.xlu0 %576  ;;  %777 = vadd.xlane.f32.xlu0 %v776_v20 }
 0x337   : > { %v466_v25 = vpop.xlane.xlu0 %465 }
 0x338   : > { %v470_v27 = vsub.f32 %v1718_v46, %v466_v25 }
 0x33a   : > { %v472_v28 = vmul.f32 1.442695, %v470_v27 }
 0x33c   : > { %1497 = vpow2.f32 %v472_v28 }
 0x33f   : > { %v580_v60 = vpop.xlane.xlu0 %579 }
 0x342   : > { %v1772_v30 = vpop.eup %1497 }
 0x343   : > { %v476_v31 = vsel %vm263_vm1, %v1772_v30, 0.0 }
 0x344   : > { %477 = vadd.xlane.f32.xlu2 %v476_v31 }
 0x345   : > { %v379_v32 = vpop.xlane.xlu1 %378 }
 0x34d   : > { %v282_v35 = vpop.xlane.xlu1 %281 }
 0x34e   : > { %1499 = vrcp.f32 %v282_v35 }
 0x34f   : > { %1501 = vrcp.f32 %v379_v32 }
 0x354   : > { %v1500_v40 = vpop.eup %1499 }
 0x355   : > { %v469_v43 = vpop.xlane.xlu1 %468  ;;  %v286_v44 = vmul.f32 %v1500_v40, %v1733_v56  ;;  %v1502_v49 = vpop.eup %1501 }
 0x356   : > { %v471_v46 = vsub.f32 %v1737_v36, %v469_v43  ;;  %v385_v51 = vmul.f32 %v1502_v49, %v1729_v54 }
 0x357   : > { %1227 = vmatmul.msk.f32.vlgmr.msra.gmra.mxu3 %vm263_vm1, %v286_v44 }
 0x358   : > { %v474_v47 = vmul.f32 1.442695, %v471_v46  ;;  %1239 = vmatpush.msk.msra.mxu3 %vm298_vm2, %v1416_v42 }
 0x35a   : > { %1503 = vpow2.f32 %v474_v47  ;;  %514 = vmatpush.msra.mxu3 %v1417_v45 }
 0x35b   : > { %1505 = vrcp.f32 %v382_v21 }
 0x35c   : > { %1429 = vrot.lane.b32.xlu2 %v1620_v4, %s1571_s16  ;;  %1507 = vrcp.f32 %v577_v24 }
 0x35f   : > { %1233 = vmatmul.msk.f32.vlgmr.msrb.gmra.mxu3 %vm263_vm1, %v385_v51 }
 0x360   : > { %v1785_v53 = vpop.eup %1503  ;;  %1253 = vmatpush.msk.msrb.mxu3 %vm298_vm2, %v1426_v50 }
 0x361   : > { %v479_v55 = vsel %vm267_vm3, %v1785_v53, 0.0  ;;  %v1506_v56 = vpop.eup %1505 }
 0x362   : > { %712 = vmatpush.msrb.mxu3 %v1427_v52  ;;  %480 = vadd.xlane.f32.xlu0 %v479_v55  ;;  %v386_v36 = vmul.f32 %v1506_v56, %v1707_v34  ;;  %v1508_v54 = vpop.eup %1507 }
 0x363   : > { %v664_v57 = vpop.xlane.xlu2 %663  ;;  %v583_v34 = vmul.f32 %v1508_v54, %v1713_v41 }
 0x364   : > { %v668_v58 = vsub.f32 %v1741_v61, %v664_v57 }
 0x366   : > { %v670_v59 = vmul.f32 1.442695, %v668_v58 }
 0x367   : > { %1234 = vmatmul.msk.f32.gmra.mxu3 %vm263_vm1, %v386_v36 }
 0x368   : > { %1509 = vpow2.f32 %v670_v59 }
 0x369   : > { %1511 = vrcp.f32 %v580_v60 }
 0x36d   : > { %v1420_v62 = vpop.permute.xlu1 %1419 }
 0x36e   : > { %v1793_v63 = vpop.eup %1509  ;;  %v1421_v0 = vunpack.i.l.bf16 %v1420_v62  ;;  %v1422_v1 = vunpack.i.h.bf16 %v1420_v62 }
 0x36f   : > { %v674_v2 = vsel %vm263_vm1, %v1793_v63, 0.0  ;;  %v1512_v61 = vpop.eup %1511 }
 0x370   : > { %675 = vadd.xlane.f32.xlu1 %v674_v2  ;;  %1246 = vmatpush.msk.msrb.mxu2 %vm298_vm2, %v1421_v0  ;;  %v584_v5 = vmul.f32 %v1512_v61, %v1724_v39 }
 0x372   : > { %613 = vmatpush.msrb.mxu2 %v1422_v1 }
 0x373   : > { %1247 = vmatmul.msk.f32.vlgmr.msrb.gmra.mxu2 %vm263_vm1, %v583_v34 }
 0x37b   : > { %1248 = vmatmul.msk.f32.gmra.mxu2 %vm263_vm1, %v584_v5 }
 0x382   : > { %v775_v7 = vpop.xlane.xlu0 %774 }
 0x38a   : > { %v667_v8 = vpop.xlane.xlu0 %666 }
 0x38b   : > { %v669_v10 = vsub.f32 %v1751_v6, %v667_v8 }
 0x38d   : > { %v672_v12 = vmul.f32 1.442695, %v669_v10 }
 0x38f   : > { %1513 = vpow2.f32 %v672_v12 }
 0x390   : > { %1515 = vpow2.f32 %v967_v13 }
 0x392   : > { %v862_v14 = vpop.xlane.xlu0 %861 }
 0x393   : > { %v866_v41 = vsub.f32 %v1755_v9, %v862_v14 }
 0x395   : > { %v1806_v15 = vpop.eup %1513  ;;  %v868_v17 = vmul.f32 1.442695, %v866_v41 }
 0x396   : > { %v677_v39 = vsel %vm267_vm3, %v1806_v15, 0.0  ;;  %v1810_v6 = vpop.eup %1515 }
 0x397   : > { %1517 = vpow2.f32 %v868_v17  ;;  %678 = vadd.xlane.f32.xlu0 %v677_v39  ;;  %v971_v20 = vsel %vm263_vm1, %v1810_v6, 0.0 }
 0x39a   : > { %v865_v18 = vpop.xlane.xlu0 %864 }
 0x39b   : > { %v867_v23 = vsub.f32 %v1761_v16, %v865_v18 }
 0x39d   : > { %v1813_v19 = vpop.eup %1517  ;;  %v870_v21 = vmul.f32 1.442695, %v867_v23 }
 0x39e   : > { %v872_v9 = vsel %vm263_vm1, %v1813_v19, 0.0 }
 0x39f   : > { %1519 = vpow2.f32 %v870_v21  ;;  %873 = vadd.xlane.f32.xlu2 %v872_v9  ;;  %972 = vadd.xlane.f32.xlu0 %v971_v20 }
 0x3a2   : > { %v778_v28 = vpop.xlane.xlu0 %777 }
 0x3a5   : > { %v1819_v24 = vpop.eup %1519 }
 0x3a6   : > { %v875_v25 = vsel %vm267_vm3, %v1819_v24, 0.0 }
 0x3a7   : > { %876 = vadd.xlane.f32.xlu1 %v875_v25 }
 0x3b3   : > { %1434 = vrot.lane.b32.xlu0 %v1620_v4, %s1572_s18 }
 0x3b7   : > { %v478_v16 = vpop.xlane.xlu2 %477 }
 0x3b8   : > { %1521 = vrcp.f32 %v478_v16 }
 0x3b9   : > { %1523 = vrcp.f32 %v775_v7 }
 0x3ba   : > { %1525 = vrcp.f32 %v778_v28  ;;  %v1291_v28 = vld [vmem:[%s1880_s2] sm:$0xff] }
 0x3be   : > { %v1522_v27 = vpop.eup %1521 }
 0x3bf   : > { %v484_v29 = vmul.f32 %v1522_v27, %v1772_v30  ;;  %v1430_v31 = vpop.permute.xlu2 %1429  ;;  %v1524_v32 = vpop.eup %1523  ;;  %v966_v30 = vsub.f32 %v1702_v26, %v1776_v33  ;;  %v1292_v27 = vld [vmem:[%s1880_s2 + $0x8] sm:$0xff] }
 0x3c0   : > { %v1432_v35 = vunpack.i.h.bf16 %v1430_v31  ;;  %v1431_v37 = vunpack.i.l.bf16 %v1430_v31  ;;  %1439 = vrot.lane.b32.xlu1 %v1620_v4, %s1573_s19  ;;  %v781_v40 = vmul.f32 %v1524_v32, %v1747_v3  ;;  %v1526_v42 = vpop.eup %1525  ;;  %1123 = vmatpush.bf16.msra.mxu1 %v1292_v27 }
 0x3c1   : > { %1240 = vmatmul.msk.f32.vlgmr.msra.gmra.mxu3 %vm263_vm1, %v484_v29  ;;  %v782_v43 = vmul.f32 %v1526_v42, %v1765_v22  ;;  %v969_v44 = vmul.f32 1.442695, %v966_v30 }
 0x3c2   : > { %1260 = vmatpush.msk.msra.mxu2 %vm298_vm2, %v1431_v37 }
 0x3c3   : > { %1527 = vpow2.f32 %v969_v44 }
 0x3c4   : > { %811 = vmatpush.msra.mxu2 %v1432_v35  ;;  %1124 = vmatpush.bf16.msra.mxu1 %v1291_v28 }
 0x3c5   : > { %1261 = vmatmul.msk.f32.vlgmr.msra.gmra.mxu2 %vm263_vm1, %v781_v40 }
 0x3c9   : > { %v1528_v45 = vpop.eup %1527 }
 0x3ca   : > { %v974_v3 = vsel %vm267_vm3, %v1528_v45, 0.0 }
 0x3cd   : > { %1262 = vmatmul.msk.f32.gmra.mxu2 %vm263_vm1, %v782_v43 }
 0x3d5   : > { %v481_v4 = vpop.xlane.xlu0 %480 }
 0x3d6   : > { %1529 = vrcp.f32 %v481_v4 }
 0x3da   : > { %v1834_v46 = vpop.f32.mrf.mxu3 }
 0x3dc   : > { %v1530_v47 = vpop.eup %1529 }
 0x3dd   : > { %975 = vadd.xlane.f32.xlu0 %v974_v3  ;;  %v485_v48 = vmul.f32 %v1530_v47, %v1785_v53 }
 0x3df   : > { %1241 = vmatmul.msk.f32.gmra.mxu3 %vm263_vm1, %v485_v48 }
 0x3e2   : > { %v417_v26 = vpop.f32.mrf.mxu3 }
 0x3e3   : > { %v676_v33 = vpop.xlane.xlu1 %675 }
 0x3e4   : > { %1531 = vrcp.f32 %v676_v33 }
 0x3ea   : > { %v1532_v22 = vpop.eup %1531  ;;  %v420_v49 = vpop.f32.mrf.mxu3 }
 0x3eb   : > { %v682_v50 = vmul.f32 %v1532_v22, %v1793_v63  ;;  %v1443_v51 = vpack.i.bf16 %v420_v49, %v417_v26 }
 0x3ed   : > { %1444 = vrot.lane.b32.xlu2 %v1443_v51, %s1574_s20  ;;  %1254 = vmatmul.msk.f32.vlgmr.msrb.gmra.mxu3 %vm263_vm1, %v682_v50 }
 0x3f6   : > { %v615_v52 = vpop.f32.mrf.mxu2 }
 0x3fe   : > { %v618_v55 = vpop.f32.mrf.mxu2 }
 0x3ff   : > { %v1448_v56 = vpack.i.bf16 %v618_v55, %v615_v52 }
 0x401   : > { %1449 = vrot.lane.b32.xlu1 %v1448_v56, %s1575_s21 }
 0x40a   : > { %v679_v53 = vpop.xlane.xlu0 %678 }
 0x40b   : > { %1533 = vrcp.f32 %v679_v53 }
 0x411   : > { %v1534_v57 = vpop.eup %1533 }
 0x412   : > { %v683_v58 = vmul.f32 %v1534_v57, %v1806_v15  ;;  %v874_v36 = vpop.xlane.xlu2 %873  ;;  %v973_v59 = vpop.xlane.xlu0 %972 }
 0x413   : > { %1535 = vrcp.f32 %v874_v36 }
 0x414   : > { %1255 = vmatmul.msk.f32.gmra.mxu3 %vm263_vm1, %v683_v58 }
 0x419   : > { %v1536_v62 = vpop.eup %1535 }
 0x41a   : > { %v877_v54 = vpop.xlane.xlu1 %876  ;;  %v880_v1 = vmul.f32 %v1536_v62, %v1813_v19 }
 0x41b   : > { %1537 = vrcp.f32 %v877_v54 }
 0x41c   : > { %1539 = vrcp.f32 %v973_v59 }
 0x421   : > { %v1538_v2 = vpop.eup %1537 }
 0x422   : > { %v881_v34 = vmul.f32 %v1538_v2, %v1819_v24  ;;  %v1540_v5 = vpop.eup %1539  ;;  %v1478_v2 = vld [vmem:[%s1881_s3] ss:$0 sm:$0xff] }
 0x423   : > { %v979_v10 = vmul.f32 %v1540_v5, %v1810_v6 }
 0x425   : > { %v1435_v60 = vpop.permute.xlu0 %1434 }
 0x426   : > { %v1436_v63 = vunpack.i.l.bf16 %v1435_v60  ;;  %v1437_v0 = vunpack.i.h.bf16 %v1435_v60 }
 0x428   : > { %1267 = vmatpush.msk.msra.mxu3 %vm298_vm2, %v1436_v63 }
 0x42a   : > { %910 = vmatpush.msra.mxu3 %v1437_v0 }
 0x42b   : > { %1268 = vmatmul.msk.f32.vlgmr.msra.gmra.mxu3 %vm263_vm1, %v880_v1  ;;  %v1131_v1 = vld [vmem:[%s212_s7] sm:$0xf] }
 0x432   : > { %v1440_v61 = vpop.permute.xlu1 %1439 }
 0x433   : > { %v1442_v7 = vunpack.i.h.bf16 %v1440_v61  ;;  %v1441_v8 = vunpack.i.l.bf16 %v1440_v61  ;;  %1269 = vmatmul.msk.f32.gmra.mxu3 %vm263_vm1, %v881_v34  ;;  %v1133_v34 = vunpack.c.l.bf16 %v1131_v1 }
 0x435   : > { %1274 = vmatpush.msk.msrb.mxu2 %vm298_vm2, %v1441_v8  ;;  %v1132_v8 = vld [vmem:[%s212_s7 + $0x4] sm:$0x3] }
 0x437   : > { %1009 = vmatpush.msrb.mxu2 %v1442_v7 }
 0x438   : > { %1275 = vmatmul.msk.f32.vlgmr.msrb.gmra.mxu2 %vm263_vm1, %v979_v10 }
 0x444   : > { %v516_v17 = vpop.f32.mrf.mxu3 }
 0x447   : > { %v1445_v31 = vpop.permute.xlu2 %1444 }
 0x448   : > { %v813_v11 = vpop.f32.mrf.mxu2  ;;  %v1447_v40 = vunpack.i.h.bf16 %v1445_v31  ;;  %v1446_v42 = vunpack.i.l.bf16 %v1445_v31 }
 0x44a   : > { %v1074_v44 = vsel %vm229_vm0, %v1834_v46, %v1447_v40  ;;  %v1073_v4 = vsel %vm229_vm0, %v1711_v38, %v1446_v42 }
 0x450   : > { %v976_v12 = vpop.xlane.xlu0 %975  ;;  %v816_v13 = vpop.f32.mrf.mxu2 }
 0x451   : > { %1541 = vrcp.f32 %v976_v12  ;;  %v1453_v14 = vpack.i.bf16 %v816_v13, %v813_v11  ;;  %v1134_v11 = vunpack.c.l.bf16 %v1132_v8 }
 0x453   : > { %1454 = vrot.lane.b32.xlu1 %v1453_v14, %s1576_s22 }
 0x457   : > { %v1542_v41 = vpop.eup %1541 }
 0x458   : > { %v980_v15 = vmul.f32 %v1542_v41, %v1528_v45 }
 0x45a   : > { %1276 = vmatmul.msk.f32.gmra.mxu2 %vm263_vm1, %v980_v15 }
 0x462   : > { %v519_v39 = vpop.f32.mrf.mxu3 }
 0x463   : > { %v1458_v18 = vpack.i.bf16 %v519_v39, %v516_v17 }
 0x465   : > { %1459 = vrot.lane.b32.xlu1 %v1458_v18, %s1577_s23 }
 0x470   : > { %v714_v6 = vpop.f32.mrf.mxu3 }
 0x473   : > { %v1450_v29 = vpop.permute.xlu1 %1449 }
 0x474   : > { %v1452_v26 = vunpack.i.h.bf16 %v1450_v29  ;;  %v1451_v33 = vunpack.i.l.bf16 %v1450_v29 }
 0x497   : > { %v717_v23 = vpop.f32.mrf.mxu3 }
 0x498   : > { %v1463_v19 = vpack.i.bf16 %v717_v23, %v714_v6 }
 0x49a   : > { %1464 = vrot.lane.b32.xlu2 %v1463_v19, %s1578_s24 }
 0x4ae   : > { %v912_v21 = vpop.f32.mrf.mxu3 }
 0x4b6   : > { %v915_v9 = vpop.f32.mrf.mxu3 }
 0x4b7   : > { %v1468_v20 = vpack.i.bf16 %v915_v9, %v912_v21 }
 0x4b9   : > { %1469 = vrot.lane.b32.xlu2 %v1468_v20, %s1579_s25 }
 0x4bb   : > { %v1011_v24 = vpop.f32.mrf.mxu2 }
 0x4c5   : > { %v1455_v32 = vpop.permute.xlu1 %1454 }
 0x4c6   : > { %v1457_v56 = vunpack.i.h.bf16 %v1455_v32  ;;  %v1456_v38 = vunpack.i.l.bf16 %v1455_v32 }
 0x4d7   : > { %v1460_v35 = vpop.permute.xlu1 %1459 }
 0x4d8   : > { %v1462_v30 = vunpack.i.h.bf16 %v1460_v35  ;;  %v1461_v43 = vunpack.i.l.bf16 %v1460_v35 }
 0x4da   : > { %v1077_v45 = vsel %vm1075_vm4, %v1074_v44, %v1462_v30  ;;  %v1076_v47 = vsel %vm1075_vm4, %v1073_v4, %v1461_v43 }
 0x4db   : > { %v1078_v49 = vsel %vm263_vm1, %v1076_v47, %v1451_v33  ;;  %v1079_v50 = vsel %vm263_vm1, %v1077_v45, %v1452_v26 }
 0x4dd   : > { %v1014_v25 = vpop.f32.mrf.mxu2 }
 0x4de   : > { %v1473_v16 = vpack.i.bf16 %v1014_v25, %v1011_v24 }
 0x4e0   : > { %1474 = vrot.lane.b32.xlu1 %v1473_v16, %s1580_s26 }
 0x4f4   : > { %v1465_v37 = vpop.permute.xlu2 %1464 }
 0x4f5   : > { %v1467_v3 = vunpack.i.h.bf16 %v1465_v37  ;;  %v1466_v48 = vunpack.i.l.bf16 %v1465_v37 }
 0x4f7   : > { %v1081_v51 = vsel %vm1080_vm5, %v1078_v49, %v1466_v48  ;;  %v1082_v52 = vsel %vm1080_vm5, %v1079_v50, %v1467_v3 }
 0x4f8   : > { %v1084_v57 = vsel %vm1083_vm6, %v1081_v51, %v1456_v38  ;;  %v1085_v58 = vsel %vm1083_vm6, %v1082_v52, %v1457_v56 }
 0x513   : > { %v1470_v22 = vpop.permute.xlu2 %1469 }
 0x514   : > { %v1472_v55 = vunpack.i.h.bf16 %v1470_v22  ;;  %v1471_v46 = vunpack.i.l.bf16 %v1470_v22 }
 0x516   : > { %v1087_v54 = vsel %vm1086_vm7, %v1084_v57, %v1471_v46  ;;  %v1088_v60 = vsel %vm1086_vm7, %v1085_v58, %v1472_v55 }
 0x552   : > { %v1475_v53 = vpop.permute.xlu1 %1474 }
 0x553   : > { %v1477_v36 = vunpack.i.h.bf16 %v1475_v53  ;;  %v1476_v59 = vunpack.i.l.bf16 %v1475_v53 }
 0x555   : > { %v1091_v62 = vsel %vm1089_vm8, %v1088_v60, %v1477_v36  ;;  %v1090_v63 = vsel %vm1089_vm8, %v1087_v54, %v1476_v59 }
 0x556   : > { %v1092_v0 = vpack.c.bf16 %v1091_v62, %v1090_v63 }
 0x558   : > { %1285 = vmatmul.msk.bf16.vlgmr.msra.gmra.mxu1 %vm1113_vm9, %v1092_v0 }
 0x5d5   : > { %v1126_v61 = vpop.f32.mrf.mxu1 }
 0x5d6   : > { %v1127_v5 = vadd.f32 %v1478_v2, %v1126_v61 }
 0x5d8   : > { %v1135_v7 = vadd.f32 %v1133_v34, %v1127_v5 }
 0x5da   : > { %v1137_v10 = vpack.c.bf16 %v1135_v7, %v1135_v7 }
 0x5dc   : > { %1140 = vst.msk [vmem:[%s217_s12] sm:$0xf] %vm1139_vm10, %v1137_v10 }
 0x5dd   : > { %v1128_v12 = vpop.f32.mrf.mxu1 }
 0x5de   : > { %v1129_v13 = vadd.f32 %v1478_v2, %v1128_v12 }
 0x5e0   : > { %v1136_v14 = vadd.f32 %v1134_v11, %v1129_v13 }
 0x5e2   : > { %v1138_v41 = vpack.c.bf16 %v1136_v14, %v1136_v14 }
 0x5e4   : > { %1142 = vst.msk [vmem:[%s217_s12 + $0x4] sm:$0x3] %vm1141_vm11, %v1138_v41 }
 0x5e5 PF: > { %s14_s15 = sadd.s32 1, %s1549_s15  }
 0x5e6   : > { %p11_p4 = scmp.ge.s32.totalorder %s14_s15, 4  }
 0x5e8   :  { %13 = sbr.rel (!%p11_p4) target bundleno = 1 (0x1), region = 69 }

</bundles_post_ra>
